<compile_context>
chip_gen: v7x
topology: tpu7x:2x2x1
jax: 0.10.0
libtpu: 0.0.40
codegen_flags: <defaults>
</compile_context>

<pallas_src>
import functools

import jax
import jax.numpy as jnp
from jax.experimental import pallas as pl
from jax.experimental.pallas import tpu as pltpu

INPUT_SIZE = 30
HIDDEN = 64
NUM_LAYERS = 2
OUTPUT_SIZE = 7
FC1_SIZE = 32
OUT_PAD = 128            # lane-dense padded output width
SUBLANE = 8              # batch padded to a multiple of this
MAX_TC = 128             # hard cap on timesteps per grid step
G1_VMEM_BUDGET = 8 << 20  # budget for the double-buffered g1 chunk (bytes)


# ---------------------------------------------------------------------------
# Kernel
# ---------------------------------------------------------------------------
def forecaster_kernel(
    g1_ref,      # (TC, Bp, 4H)  precomputed x@Wih1 + b1 (g-gate cols pre-scaled x2)
    whh1_ref,    # (H, 4H)       layer-1 recurrent weight (transposed)
    wih2_ref,    # (H, 4H)       layer-2 input weight (transposed)
    whh2_ref,    # (H, 4H)       layer-2 recurrent weight (transposed)
    b2_ref,      # (1, 4H)
    wfc1_ref,    # (H, 32)
    bfc1_ref,    # (1, 32)
    wfc2_ref,    # (32, 128)     zero-padded beyond column 7
    bfc2_ref,    # (1, 128)
    out_ref,     # (Bp, 128)
    state_ref,   # (Bp, 4H)      VMEM scratch: [h1 | c1 | h2 | c2], persists across chunks
    *, hidden, t_chunk, t_total,
):
    chunk = pl.program_id(0)
    H = hidden
    Bp = state_ref.shape[0]

    @pl.when(chunk == 0)
    def _():
        state_ref[...] = jnp.zeros_like(state_ref)

    # Gate order is [i, f, o, g]: sigmoid region = first 3H lanes.  The g-gate
    # weight columns were pre-scaled by 2, so tanh(x) = 2*sigmoid(2x) - 1 is a
    # cheap VPU fixup on the same full-width sigmoid (one EUP pass, not two).
    lane = jax.lax.broadcasted_iota(jnp.int32, (Bp, 4 * H), 1)
    sig_region = lane < 3 * H

    def act_combine(gates, c_prev):
        sig = jax.nn.sigmoid(gates)
        a = jnp.where(sig_region, sig, 2.0 * sig - 1.0)
        i = a[:, 0 * H:1 * H]
        f = a[:, 1 * H:2 * H]
        o = a[:, 2 * H:3 * H]
        g = a[:, 3 * H:4 * H]
        c_new = f * c_prev + i * g
        h_new = o * jnp.tanh(c_new)
        return h_new, c_new

    # Hoisted loop-invariant loads/broadcasts (not re-streamed per step).
    whh1 = whh1_ref[...]                                    # 16 vregs, held
    b2 = jnp.broadcast_to(b2_ref[...], (Bp, 4 * H))         # broadcast once

    needs_mask = (t_total % t_chunk) != 0   # static: only mask when T is padded

    def body(s, carry):
        h1_c, c1_c, h2_c, c2_c = carry
        # Layer-2 recurrent half first: independent of this step's layer-1
        # output, so it overlaps the layer-1 chain (esp. with partial unroll).
        g2_rec = jnp.dot(h2_c, whh2_ref[...], preferred_element_type=jnp.float32)
        # Layer 1: input projection was hoisted; one recurrent matmul per step.
        gates1 = g1_ref[s] + jnp.dot(h1_c, whh1, preferred_element_type=jnp.float32)
        h1_n, c1_n = act_combine(gates1, c1_c)
        # Layer 2: input half depends on h1_n.
        gates2 = (jnp.dot(h1_n, wih2_ref[...], preferred_element_type=jnp.float32)
                  + g2_rec + b2)
        h2_n, c2_n = act_combine(gates2, c2_c)
        if needs_mask:
            valid = (chunk * t_chunk + s) < t_total
            h1_n = jnp.where(valid, h1_n, h1_c)
            c1_n = jnp.where(valid, c1_n, c1_c)
            h2_n = jnp.where(valid, h2_n, h2_c)
            c2_n = jnp.where(valid, c2_n, c2_c)
        return h1_n, c1_n, h2_n, c2_n

    st = state_ref[...]
    carry0 = (st[:, 0 * H:1 * H], st[:, 1 * H:2 * H],
              st[:, 2 * H:3 * H], st[:, 3 * H:4 * H])
    # Latency-bound per-step chain: full unroll for small chunks, partial
    # unroll (4) otherwise so the LLO scheduler can overlap adjacent steps.
    unroll = True if t_chunk <= 16 else 4
    h1_f, c1_f, h2_f, c2_f = jax.lax.fori_loop(
        0, t_chunk, body, carry0, unroll=unroll)
    # Single lane-dense (Bp, 4H) store of the carried state.
    state_ref[...] = jnp.concatenate([h1_f, c1_f, h2_f, c2_f], axis=1)

    @pl.when(chunk == pl.num_programs(0) - 1)
    def _():
        # Head: fc1 -> ReLU -> (dropout = identity in eval) -> fc2 (lane-padded).
        z = jnp.dot(h2_f, wfc1_ref[...],
                    preferred_element_type=jnp.float32) + bfc1_ref[...]
        z = jnp.maximum(z, 0.0)
        y = jnp.dot(z, wfc2_ref[...],
                    preferred_element_type=jnp.float32) + bfc2_ref[...]
        out_ref[...] = y.astype(out_ref.dtype)


# ---------------------------------------------------------------------------
# Wrapper
# ---------------------------------------------------------------------------
def consumption_forecaster(x, kparams):
    """x: (B, T, INPUT_SIZE) float32. Returns (B, OUTPUT_SIZE) float32."""
    B, T, I = x.shape
    assert I == INPUT_SIZE

    Bp = ((B + SUBLANE - 1) // SUBLANE) * SUBLANE          # sublane-padded batch

    # Time-chunk size derived from a VMEM budget for the double-buffered g1
    # chunk (keeps the same code inside v7x's 64 MiB VMEM at larger batch).
    bytes_per_step = 2 * Bp * 4 * HIDDEN * 4               # double-buffered, f32
    tc_budget = max(1, G1_VMEM_BUDGET // bytes_per_step)
    TC = int(min(T, MAX_TC, tc_budget))
    num_chunks = pl.cdiv(T, TC)
    T_pad = num_chunks * TC

    x_pad = jnp.zeros((Bp, T, I), jnp.float32).at[:B].set(x.astype(jnp.float32))

    # Hoisted layer-1 input projection: transpose the 30-wide x (cheap) rather
    # than the 256-wide g1 afterwards, then one big (T*Bp, I) x (I, 4H) matmul.
    x_t = x_pad.transpose(1, 0, 2).reshape(T * Bp, I)       # (T*Bp, I)
    g1 = x_t @ kparams["wih1_t"] + kparams["b1"]
    g1 = g1.reshape(T, Bp, 4 * HIDDEN)                      # (T, Bp, 4H)
    if T_pad != T:
        g1 = jnp.pad(g1, ((0, T_pad - T), (0, 0), (0, 0)))

    kernel = functools.partial(
        forecaster_kernel, hidden=HIDDEN, t_chunk=TC, t_total=T)

    full2 = lambda c: (0, 0)

    # Explicit scoped-VMEM limit (v5e default ~16 MiB is hit early otherwise):
    # double-buffered g1 chunk + weights + output, plus scratch and headroom,
    # capped safely below v7x's 64 MiB physical VMEM.
    g1_block = TC * Bp * 4 * HIDDEN * 4
    weight_bytes = 4 * (3 * HIDDEN * 4 * HIDDEN + 4 * HIDDEN
                        + HIDDEN * FC1_SIZE + FC1_SIZE
                        + FC1_SIZE * OUT_PAD + OUT_PAD)
    scratch_bytes = Bp * 4 * HIDDEN * 4
    out_bytes = Bp * OUT_PAD * 4
    vmem_limit = int(min(
        max(2 * (g1_block + weight_bytes + out_bytes) + scratch_bytes + (2 << 20),
            4 << 20),
        48 << 20))

    # Advisory cost estimate for XLA's scheduler.
    per_step_flops = 3 * 2 * Bp * HIDDEN * 4 * HIDDEN       # whh1, whh2, wih2
    head_flops = 2 * Bp * HIDDEN * FC1_SIZE + 2 * Bp * FC1_SIZE * OUT_PAD
    transc = T * Bp * 2 * (4 * HIDDEN + HIDDEN)              # sigmoid(4H)+tanh(H) per layer
    bytes_acc = 4 * (T_pad * Bp * 4 * HIDDEN
                     + 3 * HIDDEN * 4 * HIDDEN + 4 * HIDDEN
                     + HIDDEN * FC1_SIZE + FC1_SIZE + FC1_SIZE * OUT_PAD + OUT_PAD
                     + Bp * OUT_PAD)
    cost = pl.CostEstimate(flops=T * per_step_flops + head_flops,
                           transcendentals=transc,
                           bytes_accessed=bytes_acc)

    y = pl.pallas_call(
        kernel,
        out_shape=jax.ShapeDtypeStruct((Bp, OUT_PAD), jnp.float32),
        grid_spec=pltpu.PrefetchScalarGridSpec(
            num_scalar_prefetch=0,
            grid=(num_chunks,),
            in_specs=[
                pl.BlockSpec((TC, Bp, 4 * HIDDEN), lambda c: (c, 0, 0)),  # g1 chunk
                pl.BlockSpec((HIDDEN, 4 * HIDDEN), full2),                # Whh1^T
                pl.BlockSpec((HIDDEN, 4 * HIDDEN), full2),                # Wih2^T
                pl.BlockSpec((HIDDEN, 4 * HIDDEN), full2),                # Whh2^T
                pl.BlockSpec((1, 4 * HIDDEN), full2),                     # b2
                pl.BlockSpec((HIDDEN, FC1_SIZE), full2),                  # fc1 W^T
                pl.BlockSpec((1, FC1_SIZE), full2),                       # fc1 b
                pl.BlockSpec((FC1_SIZE, OUT_PAD), full2),                 # fc2 W^T pad
                pl.BlockSpec((1, OUT_PAD), full2),                        # fc2 b pad
            ],
            out_specs=pl.BlockSpec((Bp, OUT_PAD), full2),
            scratch_shapes=[
                pltpu.VMEM((Bp, 4 * HIDDEN), jnp.float32),  # [h1|c1|h2|c2]
            ],
        ),
        compiler_params=pltpu.CompilerParams(
            # Time recurrence is sequential.  (On v7x with large B, add a
            # leading "parallel" batch-tile axis to use both TensorCores.)
            dimension_semantics=("arbitrary",),
            vmem_limit_bytes=vmem_limit,
        ),
        cost_estimate=cost,
    )(
        g1,
        kparams["whh1_t"], kparams["wih2_t"], kparams["whh2_t"], kparams["b2"],
        kparams["wfc1_t"], kparams["bfc1"],
        kparams["wfc2_pad"], kparams["bfc2_pad"],
    )

    return y[:B, :OUTPUT_SIZE]


# ---------------------------------------------------------------------------
# Parameters (PyTorch-convention raw params + kernel-layout preparation)
# ---------------------------------------------------------------------------
def make_params(key):
    """Raw synthetic parameters in PyTorch layout (transposed), gate order i,f,g,o."""
    keys = jax.random.split(key, 12)
    scale = 1.0 / jnp.sqrt(HIDDEN)
    u = lambda k, shape: jax.random.uniform(k, shape, jnp.float32, -scale, scale)

    wih1 = u(keys[0], (4 * HIDDEN, INPUT_SIZE))
    whh1 = u(keys[1], (4 * HIDDEN, HIDDEN))
    bih1 = u(keys[2], (4 * HIDDEN,))
    bhh1 = u(keys[3], (4 * HIDDEN,))
    wih2 = u(keys[4], (4 * HIDDEN, HIDDEN))
    whh2 = u(keys[5], (4 * HIDDEN, HIDDEN))
    bih2 = u(keys[6], (4 * HIDDEN,))
    bhh2 = u(keys[7], (4 * HIDDEN,))
    wfc1 = u(keys[8], (FC1_SIZE, HIDDEN))
    bfc1 = u(keys[9], (FC1_SIZE,))
    wfc2 = u(keys[10], (OUTPUT_SIZE, FC1_SIZE))
    bfc2 = u(keys[11], (OUTPUT_SIZE,))

    return {
        "wih1_t": wih1.T, "whh1_t": whh1.T, "b1": (bih1 + bhh1)[None, :],
        "wih2_t": wih2.T, "whh2_t": whh2.T, "b2": (bih2 + bhh2)[None, :],
        "wfc1_t": wfc1.T, "bfc1": bfc1[None, :],
        "wfc2_t": wfc2.T, "bfc2": bfc2[None, :],
    }


def _reorder_ifgo_to_ifog(w):
    """Permute the 4H gate axis (last dim) from [i,f,g,o] to [i,f,o,g]."""
    H = HIDDEN
    return jnp.concatenate(
        [w[..., : 2 * H], w[..., 3 * H: 4 * H], w[..., 2 * H: 3 * H]], axis=-1)


def _scale_g_gate(w):
    """Pre-scale the g-gate columns (last H after reorder) by 2 so the kernel
    can use tanh(x) = 2*sigmoid(2x) - 1 with a single sigmoid pass."""
    return w.at[..., 3 * HIDDEN:].multiply(2.0)


def prepare_kernel_params(p):
    """Reorder gates, pre-scale g-gate, pad fc2 to a lane-dense width."""
    r = lambda w: _scale_g_gate(_reorder_ifgo_to_ifog(w))
    wfc2_pad = jnp.zeros((FC1_SIZE, OUT_PAD), jnp.float32).at[:, :OUTPUT_SIZE].set(
        p["wfc2_t"])
    bfc2_pad = jnp.zeros((1, OUT_PAD), jnp.float32).at[:, :OUTPUT_SIZE].set(
        p["bfc2"])
    return {
        "wih1_t": r(p["wih1_t"]), "whh1_t": r(p["whh1_t"]), "b1": r(p["b1"]),
        "wih2_t": r(p["wih2_t"]), "whh2_t": r(p["whh2_t"]), "b2": r(p["b2"]),
        "wfc1_t": p["wfc1_t"], "bfc1": p["bfc1"],
        "wfc2_pad": wfc2_pad, "bfc2_pad": bfc2_pad,
    }


# ---------------------------------------------------------------------------
# Pure-JAX reference (PyTorch semantics, eval mode)
# ---------------------------------------------------------------------------
def _lstm_cell_ref(x, h, c, wih_t, whh_t, b, H):
    gates = x @ wih_t + h @ whh_t + b
    i = jax.nn.sigmoid(gates[:, 0 * H:1 * H])
    f = jax.nn.sigmoid(gates[:, 1 * H:2 * H])
    g = jnp.tanh(gates[:, 2 * H:3 * H])
    o = jax.nn.sigmoid(gates[:, 3 * H:4 * H])
    c_new = f * c + i * g
    return o * jnp.tanh(c_new), c_new


def reference_forward(x, p):
    B, T, _ = x.shape
    h1 = jnp.zeros((B, HIDDEN), jnp.float32)
    c1 = jnp.zeros((B, HIDDEN), jnp.float32)
    h2 = jnp.zeros((B, HIDDEN), jnp.float32)
    c2 = jnp.zeros((B, HIDDEN), jnp.float32)
    for t in range(T):
        x_t = x[:, t, :]
        h1, c1 = _lstm_cell_ref(x_t, h1, c1, p["wih1_t"], p["whh1_t"], p["b1"], HIDDEN)
        h2, c2 = _lstm_cell_ref(h1, h2, c2, p["wih2_t"], p["whh2_t"], p["b2"], HIDDEN)
    z = jnp.maximum(h2 @ p["wfc1_t"] + p["bfc1"], 0.0)
    return z @ p["wfc2_t"] + p["bfc2"]


if __name__ == "__main__":
    key = jax.random.PRNGKey(0)
    k_x, k_p = jax.random.split(key)

    B, T = 2, 8
    x = jax.random.normal(k_x, (B, T, INPUT_SIZE), jnp.float32)
    raw_params = make_params(k_p)
    kernel_params = prepare_kernel_params(raw_params)

    out = consumption_forecaster(x, kernel_params)
    out = jax.block_until_ready(out)

    ref = reference_forward(x, raw_params)
    assert out.shape == (B, OUTPUT_SIZE)
    assert jnp.allclose(out, ref, rtol=1e-4, atol=1e-4), (out, ref)

    print("KERNEL_OK")
</pallas_src>

<mosaic_0001>
module attributes {stable_mosaic.version = 11 : i64} {
  func.func @forecaster_kernel(%arg0: i32, %arg1: memref<8x8x256xf32, #tpu.memory_space<vmem>>, %arg2: memref<64x256xf32, #tpu.memory_space<vmem>>, %arg3: memref<64x256xf32, #tpu.memory_space<vmem>>, %arg4: memref<64x256xf32, #tpu.memory_space<vmem>>, %arg5: memref<1x256xf32, #tpu.memory_space<vmem>>, %arg6: memref<64x32xf32, #tpu.memory_space<vmem>>, %arg7: memref<1x32xf32, #tpu.memory_space<vmem>>, %arg8: memref<32x128xf32, #tpu.memory_space<vmem>>, %arg9: memref<1x128xf32, #tpu.memory_space<vmem>>, %arg10: memref<8x128xf32, #tpu.memory_space<vmem>>, %arg11: memref<8x256xf32, #tpu.memory_space<vmem>>) attributes {dimension_semantics = [#tpu.dimension_semantics<arbitrary>], iteration_bounds = array<i64: 1>, scalar_prefetch = 0 : i64, scratch_operands = 1 : i64, tpu.core_type = #tpu.core_type<tc>, window_params = [{transform_indices = @transform_0, window_bounds = array<i64: 8, 8, 256>}, {pipeline_mode = #tpu.pipeline_mode<synchronous>, transform_indices = @transform_1, window_bounds = array<i64: 64, 256>}, {pipeline_mode = #tpu.pipeline_mode<synchronous>, transform_indices = @transform_2, window_bounds = array<i64: 64, 256>}, {pipeline_mode = #tpu.pipeline_mode<synchronous>, transform_indices = @transform_3, window_bounds = array<i64: 64, 256>}, {pipeline_mode = #tpu.pipeline_mode<synchronous>, transform_indices = @transform_4, window_bounds = array<i64: 1, 256>}, {pipeline_mode = #tpu.pipeline_mode<synchronous>, transform_indices = @transform_5, window_bounds = array<i64: 64, 32>}, {pipeline_mode = #tpu.pipeline_mode<synchronous>, transform_indices = @transform_6, window_bounds = array<i64: 1, 32>}, {pipeline_mode = #tpu.pipeline_mode<synchronous>, transform_indices = @transform_7, window_bounds = array<i64: 32, 128>}, {pipeline_mode = #tpu.pipeline_mode<synchronous>, transform_indices = @transform_8, window_bounds = array<i64: 1, 128>}, {pipeline_mode = #tpu.pipeline_mode<synchronous>, transform_indices = @transform_9, window_bounds = array<i64: 8, 128>}]} {
    %c0_i32 = arith.constant 0 : i32
    %0 = arith.cmpi eq, %arg0, %c0_i32 : i32
    %1 = arith.extui %0 : i1 to i32
    %c0_i32_0 = arith.constant 0 : i32
    %2 = arith.cmpi ne, %1, %c0_i32_0 : i32
    scf.if %2 {
      %cst_130 = arith.constant 0.000000e+00 : f32
      %412 = vector.broadcast %cst_130 : f32 to vector<8x256xf32>
      %c0_131 = arith.constant 0 : index
      %c0_132 = arith.constant 0 : index
      %413 = vector.load %arg11[%c0_131, %c0_132] : memref<8x256xf32, #tpu.memory_space<vmem>>, vector<8x256xf32>
      tpu.vector_store %arg11[%c0_131, %c0_132], %412 {strides = array<i32>} : memref<8x256xf32, #tpu.memory_space<vmem>>, vector<8x256xf32>,
    } else {
    }
    %3 = tpu.iota {dimensions = array<i32: 1>} : vector<8x256xi32>
    %c192_i32 = arith.constant 192 : i32
    %4 = vector.broadcast %c192_i32 : i32 to vector<8x256xi32>
    %5 = arith.cmpi slt, %3, %4 : vector<8x256xi32>
    %c0 = arith.constant 0 : index
    %c0_1 = arith.constant 0 : index
    %6 = vector.load %arg2[%c0, %c0_1] : memref<64x256xf32, #tpu.memory_space<vmem>>, vector<64x256xf32>
    %c0_2 = arith.constant 0 : index
    %c0_3 = arith.constant 0 : index
    %7 = vector.load %arg5[%c0_2, %c0_3] : memref<1x256xf32, #tpu.memory_space<vmem>>, vector<1x256xf32>
    %8 = vector.shape_cast %7 : vector<1x256xf32> to vector<1x256xf32>
    %9 = vector.broadcast %8 : vector<1x256xf32> to vector<8x256xf32>
    %c0_4 = arith.constant 0 : index
    %c0_5 = arith.constant 0 : index
    %10 = vector.load %arg11[%c0_4, %c0_5] : memref<8x256xf32, #tpu.memory_space<vmem>>, vector<8x256xf32>
    %11 = vector.extract_strided_slice %10 {offsets = [0, 0], sizes = [8, 64], strides = [1, 1]} : vector<8x256xf32> to vector<8x64xf32>
    %12 = vector.extract_strided_slice %10 {offsets = [0, 64], sizes = [8, 64], strides = [1, 1]} : vector<8x256xf32> to vector<8x64xf32>
    %13 = vector.extract_strided_slice %10 {offsets = [0, 128], sizes = [8, 64], strides = [1, 1]} : vector<8x256xf32> to vector<8x64xf32>
    %14 = vector.extract_strided_slice %10 {offsets = [0, 192], sizes = [8, 64], strides = [1, 1]} : vector<8x256xf32> to vector<8x64xf32>
    %c0_i32_6 = arith.constant 0 : i32
    %c0_7 = arith.constant 0 : index
    %c0_8 = arith.constant 0 : index
    %15 = vector.load %arg4[%c0_7, %c0_8] : memref<64x256xf32, #tpu.memory_space<vmem>>, vector<64x256xf32>
    %cst = arith.constant dense<0.000000e+00> : vector<8x256xf32>
    %16 = tpu.matmul %13, %15, %cst {dimension_numbers = #tpu.dot_dimension_numbers<[1], [0], [0], [1], [0, 0, 1, 1], [], []>} : vector<8x64xf32>, vector<64x256xf32>, vector<8x256xf32> -> vector<8x256xf32>
    %17 = arith.index_cast %c0_i32_6 : i32 to index
    %c0_9 = arith.constant 0 : index
    %c0_10 = arith.constant 0 : index
    %18 = vector.load %arg1[%17, %c0_9, %c0_10] : memref<8x8x256xf32, #tpu.memory_space<vmem>>, vector<1x8x256xf32>
    %19 = vector.shape_cast %18 : vector<1x8x256xf32> to vector<8x256xf32>
    %cst_11 = arith.constant dense<0.000000e+00> : vector<8x256xf32>
    %20 = tpu.matmul %11, %6, %cst_11 {dimension_numbers = #tpu.dot_dimension_numbers<[1], [0], [0], [1], [0, 0, 1, 1], [], []>} : vector<8x64xf32>, vector<64x256xf32>, vector<8x256xf32> -> vector<8x256xf32>
    %21 = arith.addf %19, %20 : vector<8x256xf32>
    %22 = arith.negf %21 : vector<8x256xf32>
    %23 = math.exp %22 : vector<8x256xf32>
    %cst_12 = arith.constant 1.000000e+00 : f32
    %24 = vector.broadcast %cst_12 : f32 to vector<8x256xf32>
    %25 = arith.addf %24, %23 : vector<8x256xf32>
    %26 = arith.divf %24, %25 : vector<8x256xf32>
    %cst_13 = arith.constant 2.000000e+00 : f32
    %27 = vector.broadcast %cst_13 : f32 to vector<8x256xf32>
    %28 = arith.mulf %27, %26 : vector<8x256xf32>
    %cst_14 = arith.constant 1.000000e+00 : f32
    %29 = vector.broadcast %cst_14 : f32 to vector<8x256xf32>
    %30 = arith.subf %28, %29 : vector<8x256xf32>
    %31 = arith.select %5, %26, %30 : vector<8x256xi1>, vector<8x256xf32>
    %32 = vector.extract_strided_slice %31 {offsets = [0, 0], sizes = [8, 64], strides = [1, 1]} : vector<8x256xf32> to vector<8x64xf32>
    %33 = vector.extract_strided_slice %31 {offsets = [0, 64], sizes = [8, 64], strides = [1, 1]} : vector<8x256xf32> to vector<8x64xf32>
    %34 = vector.extract_strided_slice %31 {offsets = [0, 128], sizes = [8, 64], strides = [1, 1]} : vector<8x256xf32> to vector<8x64xf32>
    %35 = vector.extract_strided_slice %31 {offsets = [0, 192], sizes = [8, 64], strides = [1, 1]} : vector<8x256xf32> to vector<8x64xf32>
    %36 = arith.mulf %33, %12 : vector<8x64xf32>
    %37 = arith.mulf %32, %35 : vector<8x64xf32>
    %38 = arith.addf %36, %37 : vector<8x64xf32>
    %39 = math.tanh %38 : vector<8x64xf32>
    %40 = arith.mulf %34, %39 : vector<8x64xf32>
    %c0_15 = arith.constant 0 : index
    %c0_16 = arith.constant 0 : index
    %41 = vector.load %arg3[%c0_15, %c0_16] : memref<64x256xf32, #tpu.memory_space<vmem>>, vector<64x256xf32>
    %cst_17 = arith.constant dense<0.000000e+00> : vector<8x256xf32>
    %42 = tpu.matmul %40, %41, %cst_17 {dimension_numbers = #tpu.dot_dimension_numbers<[1], [0], [0], [1], [0, 0, 1, 1], [], []>} : vector<8x64xf32>, vector<64x256xf32>, vector<8x256xf32> -> vector<8x256xf32>
    %43 = arith.addf %42, %16 : vector<8x256xf32>
    %44 = arith.addf %43, %9 : vector<8x256xf32>
    %45 = arith.negf %44 : vector<8x256xf32>
    %46 = math.exp %45 : vector<8x256xf32>
    %cst_18 = arith.constant 1.000000e+00 : f32
    %47 = vector.broadcast %cst_18 : f32 to vector<8x256xf32>
    %48 = arith.addf %47, %46 : vector<8x256xf32>
    %49 = arith.divf %47, %48 : vector<8x256xf32>
    %cst_19 = arith.constant 2.000000e+00 : f32
    %50 = vector.broadcast %cst_19 : f32 to vector<8x256xf32>
    %51 = arith.mulf %50, %49 : vector<8x256xf32>
    %cst_20 = arith.constant 1.000000e+00 : f32
    %52 = vector.broadcast %cst_20 : f32 to vector<8x256xf32>
    %53 = arith.subf %51, %52 : vector<8x256xf32>
    %54 = arith.select %5, %49, %53 : vector<8x256xi1>, vector<8x256xf32>
    %55 = vector.extract_strided_slice %54 {offsets = [0, 0], sizes = [8, 64], strides = [1, 1]} : vector<8x256xf32> to vector<8x64xf32>
    %56 = vector.extract_strided_slice %54 {offsets = [0, 64], sizes = [8, 64], strides = [1, 1]} : vector<8x256xf32> to vector<8x64xf32>
    %57 = vector.extract_strided_slice %54 {offsets = [0, 128], sizes = [8, 64], strides = [1, 1]} : vector<8x256xf32> to vector<8x64xf32>
    %58 = vector.extract_strided_slice %54 {offsets = [0, 192], sizes = [8, 64], strides = [1, 1]} : vector<8x256xf32> to vector<8x64xf32>
    %59 = arith.mulf %56, %14 : vector<8x64xf32>
    %60 = arith.mulf %55, %58 : vector<8x64xf32>
    %61 = arith.addf %59, %60 : vector<8x64xf32>
    %62 = math.tanh %61 : vector<8x64xf32>
    %63 = arith.mulf %57, %62 : vector<8x64xf32>
    %c1_i32 = arith.constant 1 : i32
    %c0_21 = arith.constant 0 : index
    %c0_22 = arith.constant 0 : index
    %64 = vector.load %arg4[%c0_21, %c0_22] : memref<64x256xf32, #tpu.memory_space<vmem>>, vector<64x256xf32>
    %cst_23 = arith.constant dense<0.000000e+00> : vector<8x256xf32>
    %65 = tpu.matmul %63, %64, %cst_23 {dimension_numbers = #tpu.dot_dimension_numbers<[1], [0], [0], [1], [0, 0, 1, 1], [], []>} : vector<8x64xf32>, vector<64x256xf32>, vector<8x256xf32> -> vector<8x256xf32>
    %66 = arith.index_cast %c1_i32 : i32 to index
    %c0_24 = arith.constant 0 : index
    %c0_25 = arith.constant 0 : index
    %67 = vector.load %arg1[%66, %c0_24, %c0_25] : memref<8x8x256xf32, #tpu.memory_space<vmem>>, vector<1x8x256xf32>
    %68 = vector.shape_cast %67 : vector<1x8x256xf32> to vector<8x256xf32>
    %cst_26 = arith.constant dense<0.000000e+00> : vector<8x256xf32>
    %69 = tpu.matmul %40, %6, %cst_26 {dimension_numbers = #tpu.dot_dimension_numbers<[1], [0], [0], [1], [0, 0, 1, 1], [], []>} : vector<8x64xf32>, vector<64x256xf32>, vector<8x256xf32> -> vector<8x256xf32>
    %70 = arith.addf %68, %69 : vector<8x256xf32>
    %71 = arith.negf %70 : vector<8x256xf32>
    %72 = math.exp %71 : vector<8x256xf32>
    %cst_27 = arith.constant 1.000000e+00 : f32
    %73 = vector.broadcast %cst_27 : f32 to vector<8x256xf32>
    %74 = arith.addf %73, %72 : vector<8x256xf32>
    %75 = arith.divf %73, %74 : vector<8x256xf32>
    %cst_28 = arith.constant 2.000000e+00 : f32
    %76 = vector.broadcast %cst_28 : f32 to vector<8x256xf32>
    %77 = arith.mulf %76, %75 : vector<8x256xf32>
    %cst_29 = arith.constant 1.000000e+00 : f32
    %78 = vector.broadcast %cst_29 : f32 to vector<8x256xf32>
    %79 = arith.subf %77, %78 : vector<8x256xf32>
    %80 = arith.select %5, %75, %79 : vector<8x256xi1>, vector<8x256xf32>
    %81 = vector.extract_strided_slice %80 {offsets = [0, 0], sizes = [8, 64], strides = [1, 1]} : vector<8x256xf32> to vector<8x64xf32>
    %82 = vector.extract_strided_slice %80 {offsets = [0, 64], sizes = [8, 64], strides = [1, 1]} : vector<8x256xf32> to vector<8x64xf32>
    %83 = vector.extract_strided_slice %80 {offsets = [0, 128], sizes = [8, 64], strides = [1, 1]} : vector<8x256xf32> to vector<8x64xf32>
    %84 = vector.extract_strided_slice %80 {offsets = [0, 192], sizes = [8, 64], strides = [1, 1]} : vector<8x256xf32> to vector<8x64xf32>
    %85 = arith.mulf %82, %38 : vector<8x64xf32>
    %86 = arith.mulf %81, %84 : vector<8x64xf32>
    %87 = arith.addf %85, %86 : vector<8x64xf32>
    %88 = math.tanh %87 : vector<8x64xf32>
    %89 = arith.mulf %83, %88 : vector<8x64xf32>
    %c0_30 = arith.constant 0 : index
    %c0_31 = arith.constant 0 : index
    %90 = vector.load %arg3[%c0_30, %c0_31] : memref<64x256xf32, #tpu.memory_space<vmem>>, vector<64x256xf32>
    %cst_32 = arith.constant dense<0.000000e+00> : vector<8x256xf32>
    %91 = tpu.matmul %89, %90, %cst_32 {dimension_numbers = #tpu.dot_dimension_numbers<[1], [0], [0], [1], [0, 0, 1, 1], [], []>} : vector<8x64xf32>, vector<64x256xf32>, vector<8x256xf32> -> vector<8x256xf32>
    %92 = arith.addf %91, %65 : vector<8x256xf32>
    %93 = arith.addf %92, %9 : vector<8x256xf32>
    %94 = arith.negf %93 : vector<8x256xf32>
    %95 = math.exp %94 : vector<8x256xf32>
    %cst_33 = arith.constant 1.000000e+00 : f32
    %96 = vector.broadcast %cst_33 : f32 to vector<8x256xf32>
    %97 = arith.addf %96, %95 : vector<8x256xf32>
    %98 = arith.divf %96, %97 : vector<8x256xf32>
    %cst_34 = arith.constant 2.000000e+00 : f32
    %99 = vector.broadcast %cst_34 : f32 to vector<8x256xf32>
    %100 = arith.mulf %99, %98 : vector<8x256xf32>
    %cst_35 = arith.constant 1.000000e+00 : f32
    %101 = vector.broadcast %cst_35 : f32 to vector<8x256xf32>
    %102 = arith.subf %100, %101 : vector<8x256xf32>
    %103 = arith.select %5, %98, %102 : vector<8x256xi1>, vector<8x256xf32>
    %104 = vector.extract_strided_slice %103 {offsets = [0, 0], sizes = [8, 64], strides = [1, 1]} : vector<8x256xf32> to vector<8x64xf32>
    %105 = vector.extract_strided_slice %103 {offsets = [0, 64], sizes = [8, 64], strides = [1, 1]} : vector<8x256xf32> to vector<8x64xf32>
    %106 = vector.extract_strided_slice %103 {offsets = [0, 128], sizes = [8, 64], strides = [1, 1]} : vector<8x256xf32> to vector<8x64xf32>
    %107 = vector.extract_strided_slice %103 {offsets = [0, 192], sizes = [8, 64], strides = [1, 1]} : vector<8x256xf32> to vector<8x64xf32>
    %108 = arith.mulf %105, %61 : vector<8x64xf32>
    %109 = arith.mulf %104, %107 : vector<8x64xf32>
    %110 = arith.addf %108, %109 : vector<8x64xf32>
    %111 = math.tanh %110 : vector<8x64xf32>
    %112 = arith.mulf %106, %111 : vector<8x64xf32>
    %c2_i32 = arith.constant 2 : i32
    %c0_36 = arith.constant 0 : index
    %c0_37 = arith.constant 0 : index
    %113 = vector.load %arg4[%c0_36, %c0_37] : memref<64x256xf32, #tpu.memory_space<vmem>>, vector<64x256xf32>
    %cst_38 = arith.constant dense<0.000000e+00> : vector<8x256xf32>
    %114 = tpu.matmul %112, %113, %cst_38 {dimension_numbers = #tpu.dot_dimension_numbers<[1], [0], [0], [1], [0, 0, 1, 1], [], []>} : vector<8x64xf32>, vector<64x256xf32>, vector<8x256xf32> -> vector<8x256xf32>
    %115 = arith.index_cast %c2_i32 : i32 to index
    %c0_39 = arith.constant 0 : index
    %c0_40 = arith.constant 0 : index
    %116 = vector.load %arg1[%115, %c0_39, %c0_40] : memref<8x8x256xf32, #tpu.memory_space<vmem>>, vector<1x8x256xf32>
    %117 = vector.shape_cast %116 : vector<1x8x256xf32> to vector<8x256xf32>
    %cst_41 = arith.constant dense<0.000000e+00> : vector<8x256xf32>
    %118 = tpu.matmul %89, %6, %cst_41 {dimension_numbers = #tpu.dot_dimension_numbers<[1], [0], [0], [1], [0, 0, 1, 1], [], []>} : vector<8x64xf32>, vector<64x256xf32>, vector<8x256xf32> -> vector<8x256xf32>
    %119 = arith.addf %117, %118 : vector<8x256xf32>
    %120 = arith.negf %119 : vector<8x256xf32>
    %121 = math.exp %120 : vector<8x256xf32>
    %cst_42 = arith.constant 1.000000e+00 : f32
    %122 = vector.broadcast %cst_42 : f32 to vector<8x256xf32>
    %123 = arith.addf %122, %121 : vector<8x256xf32>
    %124 = arith.divf %122, %123 : vector<8x256xf32>
    %cst_43 = arith.constant 2.000000e+00 : f32
    %125 = vector.broadcast %cst_43 : f32 to vector<8x256xf32>
    %126 = arith.mulf %125, %124 : vector<8x256xf32>
    %cst_44 = arith.constant 1.000000e+00 : f32
    %127 = vector.broadcast %cst_44 : f32 to vector<8x256xf32>
    %128 = arith.subf %126, %127 : vector<8x256xf32>
    %129 = arith.select %5, %124, %128 : vector<8x256xi1>, vector<8x256xf32>
    %130 = vector.extract_strided_slice %129 {offsets = [0, 0], sizes = [8, 64], strides = [1, 1]} : vector<8x256xf32> to vector<8x64xf32>
    %131 = vector.extract_strided_slice %129 {offsets = [0, 64], sizes = [8, 64], strides = [1, 1]} : vector<8x256xf32> to vector<8x64xf32>
    %132 = vector.extract_strided_slice %129 {offsets = [0, 128], sizes = [8, 64], strides = [1, 1]} : vector<8x256xf32> to vector<8x64xf32>
    %133 = vector.extract_strided_slice %129 {offsets = [0, 192], sizes = [8, 64], strides = [1, 1]} : vector<8x256xf32> to vector<8x64xf32>
    %134 = arith.mulf %131, %87 : vector<8x64xf32>
    %135 = arith.mulf %130, %133 : vector<8x64xf32>
    %136 = arith.addf %134, %135 : vector<8x64xf32>
    %137 = math.tanh %136 : vector<8x64xf32>
    %138 = arith.mulf %132, %137 : vector<8x64xf32>
    %c0_45 = arith.constant 0 : index
    %c0_46 = arith.constant 0 : index
    %139 = vector.load %arg3[%c0_45, %c0_46] : memref<64x256xf32, #tpu.memory_space<vmem>>, vector<64x256xf32>
    %cst_47 = arith.constant dense<0.000000e+00> : vector<8x256xf32>
    %140 = tpu.matmul %138, %139, %cst_47 {dimension_numbers = #tpu.dot_dimension_numbers<[1], [0], [0], [1], [0, 0, 1, 1], [], []>} : vector<8x64xf32>, vector<64x256xf32>, vector<8x256xf32> -> vector<8x256xf32>
    %141 = arith.addf %140, %114 : vector<8x256xf32>
    %142 = arith.addf %141, %9 : vector<8x256xf32>
    %143 = arith.negf %142 : vector<8x256xf32>
    %144 = math.exp %143 : vector<8x256xf32>
    %cst_48 = arith.constant 1.000000e+00 : f32
    %145 = vector.broadcast %cst_48 : f32 to vector<8x256xf32>
    %146 = arith.addf %145, %144 : vector<8x256xf32>
    %147 = arith.divf %145, %146 : vector<8x256xf32>
    %cst_49 = arith.constant 2.000000e+00 : f32
    %148 = vector.broadcast %cst_49 : f32 to vector<8x256xf32>
    %149 = arith.mulf %148, %147 : vector<8x256xf32>
    %cst_50 = arith.constant 1.000000e+00 : f32
    %150 = vector.broadcast %cst_50 : f32 to vector<8x256xf32>
    %151 = arith.subf %149, %150 : vector<8x256xf32>
    %152 = arith.select %5, %147, %151 : vector<8x256xi1>, vector<8x256xf32>
    %153 = vector.extract_strided_slice %152 {offsets = [0, 0], sizes = [8, 64], strides = [1, 1]} : vector<8x256xf32> to vector<8x64xf32>
    %154 = vector.extract_strided_slice %152 {offsets = [0, 64], sizes = [8, 64], strides = [1, 1]} : vector<8x256xf32> to vector<8x64xf32>
    %155 = vector.extract_strided_slice %152 {offsets = [0, 128], sizes = [8, 64], strides = [1, 1]} : vector<8x256xf32> to vector<8x64xf32>
    %156 = vector.extract_strided_slice %152 {offsets = [0, 192], sizes = [8, 64], strides = [1, 1]} : vector<8x256xf32> to vector<8x64xf32>
    %157 = arith.mulf %154, %110 : vector<8x64xf32>
    %158 = arith.mulf %153, %156 : vector<8x64xf32>
    %159 = arith.addf %157, %158 : vector<8x64xf32>
    %160 = math.tanh %159 : vector<8x64xf32>
    %161 = arith.mulf %155, %160 : vector<8x64xf32>
    %c3_i32 = arith.constant 3 : i32
    %c0_51 = arith.constant 0 : index
    %c0_52 = arith.constant 0 : index
    %162 = vector.load %arg4[%c0_51, %c0_52] : memref<64x256xf32, #tpu.memory_space<vmem>>, vector<64x256xf32>
    %cst_53 = arith.constant dense<0.000000e+00> : vector<8x256xf32>
    %163 = tpu.matmul %161, %162, %cst_53 {dimension_numbers = #tpu.dot_dimension_numbers<[1], [0], [0], [1], [0, 0, 1, 1], [], []>} : vector<8x64xf32>, vector<64x256xf32>, vector<8x256xf32> -> vector<8x256xf32>
    %164 = arith.index_cast %c3_i32 : i32 to index
    %c0_54 = arith.constant 0 : index
    %c0_55 = arith.constant 0 : index
    %165 = vector.load %arg1[%164, %c0_54, %c0_55] : memref<8x8x256xf32, #tpu.memory_space<vmem>>, vector<1x8x256xf32>
    %166 = vector.shape_cast %165 : vector<1x8x256xf32> to vector<8x256xf32>
    %cst_56 = arith.constant dense<0.000000e+00> : vector<8x256xf32>
    %167 = tpu.matmul %138, %6, %cst_56 {dimension_numbers = #tpu.dot_dimension_numbers<[1], [0], [0], [1], [0, 0, 1, 1], [], []>} : vector<8x64xf32>, vector<64x256xf32>, vector<8x256xf32> -> vector<8x256xf32>
    %168 = arith.addf %166, %167 : vector<8x256xf32>
    %169 = arith.negf %168 : vector<8x256xf32>
    %170 = math.exp %169 : vector<8x256xf32>
    %cst_57 = arith.constant 1.000000e+00 : f32
    %171 = vector.broadcast %cst_57 : f32 to vector<8x256xf32>
    %172 = arith.addf %171, %170 : vector<8x256xf32>
    %173 = arith.divf %171, %172 : vector<8x256xf32>
    %cst_58 = arith.constant 2.000000e+00 : f32
    %174 = vector.broadcast %cst_58 : f32 to vector<8x256xf32>
    %175 = arith.mulf %174, %173 : vector<8x256xf32>
    %cst_59 = arith.constant 1.000000e+00 : f32
    %176 = vector.broadcast %cst_59 : f32 to vector<8x256xf32>
    %177 = arith.subf %175, %176 : vector<8x256xf32>
    %178 = arith.select %5, %173, %177 : vector<8x256xi1>, vector<8x256xf32>
    %179 = vector.extract_strided_slice %178 {offsets = [0, 0], sizes = [8, 64], strides = [1, 1]} : vector<8x256xf32> to vector<8x64xf32>
    %180 = vector.extract_strided_slice %178 {offsets = [0, 64], sizes = [8, 64], strides = [1, 1]} : vector<8x256xf32> to vector<8x64xf32>
    %181 = vector.extract_strided_slice %178 {offsets = [0, 128], sizes = [8, 64], strides = [1, 1]} : vector<8x256xf32> to vector<8x64xf32>
    %182 = vector.extract_strided_slice %178 {offsets = [0, 192], sizes = [8, 64], strides = [1, 1]} : vector<8x256xf32> to vector<8x64xf32>
    %183 = arith.mulf %180, %136 : vector<8x64xf32>
    %184 = arith.mulf %179, %182 : vector<8x64xf32>
    %185 = arith.addf %183, %184 : vector<8x64xf32>
    %186 = math.tanh %185 : vector<8x64xf32>
    %187 = arith.mulf %181, %186 : vector<8x64xf32>
    %c0_60 = arith.constant 0 : index
    %c0_61 = arith.constant 0 : index
    %188 = vector.load %arg3[%c0_60, %c0_61] : memref<64x256xf32, #tpu.memory_space<vmem>>, vector<64x256xf32>
    %cst_62 = arith.constant dense<0.000000e+00> : vector<8x256xf32>
    %189 = tpu.matmul %187, %188, %cst_62 {dimension_numbers = #tpu.dot_dimension_numbers<[1], [0], [0], [1], [0, 0, 1, 1], [], []>} : vector<8x64xf32>, vector<64x256xf32>, vector<8x256xf32> -> vector<8x256xf32>
    %190 = arith.addf %189, %163 : vector<8x256xf32>
    %191 = arith.addf %190, %9 : vector<8x256xf32>
    %192 = arith.negf %191 : vector<8x256xf32>
    %193 = math.exp %192 : vector<8x256xf32>
    %cst_63 = arith.constant 1.000000e+00 : f32
    %194 = vector.broadcast %cst_63 : f32 to vector<8x256xf32>
    %195 = arith.addf %194, %193 : vector<8x256xf32>
    %196 = arith.divf %194, %195 : vector<8x256xf32>
    %cst_64 = arith.constant 2.000000e+00 : f32
    %197 = vector.broadcast %cst_64 : f32 to vector<8x256xf32>
    %198 = arith.mulf %197, %196 : vector<8x256xf32>
    %cst_65 = arith.constant 1.000000e+00 : f32
    %199 = vector.broadcast %cst_65 : f32 to vector<8x256xf32>
    %200 = arith.subf %198, %199 : vector<8x256xf32>
    %201 = arith.select %5, %196, %200 : vector<8x256xi1>, vector<8x256xf32>
    %202 = vector.extract_strided_slice %201 {offsets = [0, 0], sizes = [8, 64], strides = [1, 1]} : vector<8x256xf32> to vector<8x64xf32>
    %203 = vector.extract_strided_slice %201 {offsets = [0, 64], sizes = [8, 64], strides = [1, 1]} : vector<8x256xf32> to vector<8x64xf32>
    %204 = vector.extract_strided_slice %201 {offsets = [0, 128], sizes = [8, 64], strides = [1, 1]} : vector<8x256xf32> to vector<8x64xf32>
    %205 = vector.extract_strided_slice %201 {offsets = [0, 192], sizes = [8, 64], strides = [1, 1]} : vector<8x256xf32> to vector<8x64xf32>
    %206 = arith.mulf %203, %159 : vector<8x64xf32>
    %207 = arith.mulf %202, %205 : vector<8x64xf32>
    %208 = arith.addf %206, %207 : vector<8x64xf32>
    %209 = math.tanh %208 : vector<8x64xf32>
    %210 = arith.mulf %204, %209 : vector<8x64xf32>
    %c4_i32 = arith.constant 4 : i32
    %c0_66 = arith.constant 0 : index
    %c0_67 = arith.constant 0 : index
    %211 = vector.load %arg4[%c0_66, %c0_67] : memref<64x256xf32, #tpu.memory_space<vmem>>, vector<64x256xf32>
    %cst_68 = arith.constant dense<0.000000e+00> : vector<8x256xf32>
    %212 = tpu.matmul %210, %211, %cst_68 {dimension_numbers = #tpu.dot_dimension_numbers<[1], [0], [0], [1], [0, 0, 1, 1], [], []>} : vector<8x64xf32>, vector<64x256xf32>, vector<8x256xf32> -> vector<8x256xf32>
    %213 = arith.index_cast %c4_i32 : i32 to index
    %c0_69 = arith.constant 0 : index
    %c0_70 = arith.constant 0 : index
    %214 = vector.load %arg1[%213, %c0_69, %c0_70] : memref<8x8x256xf32, #tpu.memory_space<vmem>>, vector<1x8x256xf32>
    %215 = vector.shape_cast %214 : vector<1x8x256xf32> to vector<8x256xf32>
    %cst_71 = arith.constant dense<0.000000e+00> : vector<8x256xf32>
    %216 = tpu.matmul %187, %6, %cst_71 {dimension_numbers = #tpu.dot_dimension_numbers<[1], [0], [0], [1], [0, 0, 1, 1], [], []>} : vector<8x64xf32>, vector<64x256xf32>, vector<8x256xf32> -> vector<8x256xf32>
    %217 = arith.addf %215, %216 : vector<8x256xf32>
    %218 = arith.negf %217 : vector<8x256xf32>
    %219 = math.exp %218 : vector<8x256xf32>
    %cst_72 = arith.constant 1.000000e+00 : f32
    %220 = vector.broadcast %cst_72 : f32 to vector<8x256xf32>
    %221 = arith.addf %220, %219 : vector<8x256xf32>
    %222 = arith.divf %220, %221 : vector<8x256xf32>
    %cst_73 = arith.constant 2.000000e+00 : f32
    %223 = vector.broadcast %cst_73 : f32 to vector<8x256xf32>
    %224 = arith.mulf %223, %222 : vector<8x256xf32>
    %cst_74 = arith.constant 1.000000e+00 : f32
    %225 = vector.broadcast %cst_74 : f32 to vector<8x256xf32>
    %226 = arith.subf %224, %225 : vector<8x256xf32>
    %227 = arith.select %5, %222, %226 : vector<8x256xi1>, vector<8x256xf32>
    %228 = vector.extract_strided_slice %227 {offsets = [0, 0], sizes = [8, 64], strides = [1, 1]} : vector<8x256xf32> to vector<8x64xf32>
    %229 = vector.extract_strided_slice %227 {offsets = [0, 64], sizes = [8, 64], strides = [1, 1]} : vector<8x256xf32> to vector<8x64xf32>
    %230 = vector.extract_strided_slice %227 {offsets = [0, 128], sizes = [8, 64], strides = [1, 1]} : vector<8x256xf32> to vector<8x64xf32>
    %231 = vector.extract_strided_slice %227 {offsets = [0, 192], sizes = [8, 64], strides = [1, 1]} : vector<8x256xf32> to vector<8x64xf32>
    %232 = arith.mulf %229, %185 : vector<8x64xf32>
    %233 = arith.mulf %228, %231 : vector<8x64xf32>
    %234 = arith.addf %232, %233 : vector<8x64xf32>
    %235 = math.tanh %234 : vector<8x64xf32>
    %236 = arith.mulf %230, %235 : vector<8x64xf32>
    %c0_75 = arith.constant 0 : index
    %c0_76 = arith.constant 0 : index
    %237 = vector.load %arg3[%c0_75, %c0_76] : memref<64x256xf32, #tpu.memory_space<vmem>>, vector<64x256xf32>
    %cst_77 = arith.constant dense<0.000000e+00> : vector<8x256xf32>
    %238 = tpu.matmul %236, %237, %cst_77 {dimension_numbers = #tpu.dot_dimension_numbers<[1], [0], [0], [1], [0, 0, 1, 1], [], []>} : vector<8x64xf32>, vector<64x256xf32>, vector<8x256xf32> -> vector<8x256xf32>
    %239 = arith.addf %238, %212 : vector<8x256xf32>
    %240 = arith.addf %239, %9 : vector<8x256xf32>
    %241 = arith.negf %240 : vector<8x256xf32>
    %242 = math.exp %241 : vector<8x256xf32>
    %cst_78 = arith.constant 1.000000e+00 : f32
    %243 = vector.broadcast %cst_78 : f32 to vector<8x256xf32>
    %244 = arith.addf %243, %242 : vector<8x256xf32>
    %245 = arith.divf %243, %244 : vector<8x256xf32>
    %cst_79 = arith.constant 2.000000e+00 : f32
    %246 = vector.broadcast %cst_79 : f32 to vector<8x256xf32>
    %247 = arith.mulf %246, %245 : vector<8x256xf32>
    %cst_80 = arith.constant 1.000000e+00 : f32
    %248 = vector.broadcast %cst_80 : f32 to vector<8x256xf32>
    %249 = arith.subf %247, %248 : vector<8x256xf32>
    %250 = arith.select %5, %245, %249 : vector<8x256xi1>, vector<8x256xf32>
    %251 = vector.extract_strided_slice %250 {offsets = [0, 0], sizes = [8, 64], strides = [1, 1]} : vector<8x256xf32> to vector<8x64xf32>
    %252 = vector.extract_strided_slice %250 {offsets = [0, 64], sizes = [8, 64], strides = [1, 1]} : vector<8x256xf32> to vector<8x64xf32>
    %253 = vector.extract_strided_slice %250 {offsets = [0, 128], sizes = [8, 64], strides = [1, 1]} : vector<8x256xf32> to vector<8x64xf32>
    %254 = vector.extract_strided_slice %250 {offsets = [0, 192], sizes = [8, 64], strides = [1, 1]} : vector<8x256xf32> to vector<8x64xf32>
    %255 = arith.mulf %252, %208 : vector<8x64xf32>
    %256 = arith.mulf %251, %254 : vector<8x64xf32>
    %257 = arith.addf %255, %256 : vector<8x64xf32>
    %258 = math.tanh %257 : vector<8x64xf32>
    %259 = arith.mulf %253, %258 : vector<8x64xf32>
    %c5_i32 = arith.constant 5 : i32
    %c0_81 = arith.constant 0 : index
    %c0_82 = arith.constant 0 : index
    %260 = vector.load %arg4[%c0_81, %c0_82] : memref<64x256xf32, #tpu.memory_space<vmem>>, vector<64x256xf32>
    %cst_83 = arith.constant dense<0.000000e+00> : vector<8x256xf32>
    %261 = tpu.matmul %259, %260, %cst_83 {dimension_numbers = #tpu.dot_dimension_numbers<[1], [0], [0], [1], [0, 0, 1, 1], [], []>} : vector<8x64xf32>, vector<64x256xf32>, vector<8x256xf32> -> vector<8x256xf32>
    %262 = arith.index_cast %c5_i32 : i32 to index
    %c0_84 = arith.constant 0 : index
    %c0_85 = arith.constant 0 : index
    %263 = vector.load %arg1[%262, %c0_84, %c0_85] : memref<8x8x256xf32, #tpu.memory_space<vmem>>, vector<1x8x256xf32>
    %264 = vector.shape_cast %263 : vector<1x8x256xf32> to vector<8x256xf32>
    %cst_86 = arith.constant dense<0.000000e+00> : vector<8x256xf32>
    %265 = tpu.matmul %236, %6, %cst_86 {dimension_numbers = #tpu.dot_dimension_numbers<[1], [0], [0], [1], [0, 0, 1, 1], [], []>} : vector<8x64xf32>, vector<64x256xf32>, vector<8x256xf32> -> vector<8x256xf32>
    %266 = arith.addf %264, %265 : vector<8x256xf32>
    %267 = arith.negf %266 : vector<8x256xf32>
    %268 = math.exp %267 : vector<8x256xf32>
    %cst_87 = arith.constant 1.000000e+00 : f32
    %269 = vector.broadcast %cst_87 : f32 to vector<8x256xf32>
    %270 = arith.addf %269, %268 : vector<8x256xf32>
    %271 = arith.divf %269, %270 : vector<8x256xf32>
    %cst_88 = arith.constant 2.000000e+00 : f32
    %272 = vector.broadcast %cst_88 : f32 to vector<8x256xf32>
    %273 = arith.mulf %272, %271 : vector<8x256xf32>
    %cst_89 = arith.constant 1.000000e+00 : f32
    %274 = vector.broadcast %cst_89 : f32 to vector<8x256xf32>
    %275 = arith.subf %273, %274 : vector<8x256xf32>
    %276 = arith.select %5, %271, %275 : vector<8x256xi1>, vector<8x256xf32>
    %277 = vector.extract_strided_slice %276 {offsets = [0, 0], sizes = [8, 64], strides = [1, 1]} : vector<8x256xf32> to vector<8x64xf32>
    %278 = vector.extract_strided_slice %276 {offsets = [0, 64], sizes = [8, 64], strides = [1, 1]} : vector<8x256xf32> to vector<8x64xf32>
    %279 = vector.extract_strided_slice %276 {offsets = [0, 128], sizes = [8, 64], strides = [1, 1]} : vector<8x256xf32> to vector<8x64xf32>
    %280 = vector.extract_strided_slice %276 {offsets = [0, 192], sizes = [8, 64], strides = [1, 1]} : vector<8x256xf32> to vector<8x64xf32>
    %281 = arith.mulf %278, %234 : vector<8x64xf32>
    %282 = arith.mulf %277, %280 : vector<8x64xf32>
    %283 = arith.addf %281, %282 : vector<8x64xf32>
    %284 = math.tanh %283 : vector<8x64xf32>
    %285 = arith.mulf %279, %284 : vector<8x64xf32>
    %c0_90 = arith.constant 0 : index
    %c0_91 = arith.constant 0 : index
    %286 = vector.load %arg3[%c0_90, %c0_91] : memref<64x256xf32, #tpu.memory_space<vmem>>, vector<64x256xf32>
    %cst_92 = arith.constant dense<0.000000e+00> : vector<8x256xf32>
    %287 = tpu.matmul %285, %286, %cst_92 {dimension_numbers = #tpu.dot_dimension_numbers<[1], [0], [0], [1], [0, 0, 1, 1], [], []>} : vector<8x64xf32>, vector<64x256xf32>, vector<8x256xf32> -> vector<8x256xf32>
    %288 = arith.addf %287, %261 : vector<8x256xf32>
    %289 = arith.addf %288, %9 : vector<8x256xf32>
    %290 = arith.negf %289 : vector<8x256xf32>
    %291 = math.exp %290 : vector<8x256xf32>
    %cst_93 = arith.constant 1.000000e+00 : f32
    %292 = vector.broadcast %cst_93 : f32 to vector<8x256xf32>
    %293 = arith.addf %292, %291 : vector<8x256xf32>
    %294 = arith.divf %292, %293 : vector<8x256xf32>
    %cst_94 = arith.constant 2.000000e+00 : f32
    %295 = vector.broadcast %cst_94 : f32 to vector<8x256xf32>
    %296 = arith.mulf %295, %294 : vector<8x256xf32>
    %cst_95 = arith.constant 1.000000e+00 : f32
    %297 = vector.broadcast %cst_95 : f32 to vector<8x256xf32>
    %298 = arith.subf %296, %297 : vector<8x256xf32>
    %299 = arith.select %5, %294, %298 : vector<8x256xi1>, vector<8x256xf32>
    %300 = vector.extract_strided_slice %299 {offsets = [0, 0], sizes = [8, 64], strides = [1, 1]} : vector<8x256xf32> to vector<8x64xf32>
    %301 = vector.extract_strided_slice %299 {offsets = [0, 64], sizes = [8, 64], strides = [1, 1]} : vector<8x256xf32> to vector<8x64xf32>
    %302 = vector.extract_strided_slice %299 {offsets = [0, 128], sizes = [8, 64], strides = [1, 1]} : vector<8x256xf32> to vector<8x64xf32>
    %303 = vector.extract_strided_slice %299 {offsets = [0, 192], sizes = [8, 64], strides = [1, 1]} : vector<8x256xf32> to vector<8x64xf32>
    %304 = arith.mulf %301, %257 : vector<8x64xf32>
    %305 = arith.mulf %300, %303 : vector<8x64xf32>
    %306 = arith.addf %304, %305 : vector<8x64xf32>
    %307 = math.tanh %306 : vector<8x64xf32>
    %308 = arith.mulf %302, %307 : vector<8x64xf32>
    %c6_i32 = arith.constant 6 : i32
    %c0_96 = arith.constant 0 : index
    %c0_97 = arith.constant 0 : index
    %309 = vector.load %arg4[%c0_96, %c0_97] : memref<64x256xf32, #tpu.memory_space<vmem>>, vector<64x256xf32>
    %cst_98 = arith.constant dense<0.000000e+00> : vector<8x256xf32>
    %310 = tpu.matmul %308, %309, %cst_98 {dimension_numbers = #tpu.dot_dimension_numbers<[1], [0], [0], [1], [0, 0, 1, 1], [], []>} : vector<8x64xf32>, vector<64x256xf32>, vector<8x256xf32> -> vector<8x256xf32>
    %311 = arith.index_cast %c6_i32 : i32 to index
    %c0_99 = arith.constant 0 : index
    %c0_100 = arith.constant 0 : index
    %312 = vector.load %arg1[%311, %c0_99, %c0_100] : memref<8x8x256xf32, #tpu.memory_space<vmem>>, vector<1x8x256xf32>
    %313 = vector.shape_cast %312 : vector<1x8x256xf32> to vector<8x256xf32>
    %cst_101 = arith.constant dense<0.000000e+00> : vector<8x256xf32>
    %314 = tpu.matmul %285, %6, %cst_101 {dimension_numbers = #tpu.dot_dimension_numbers<[1], [0], [0], [1], [0, 0, 1, 1], [], []>} : vector<8x64xf32>, vector<64x256xf32>, vector<8x256xf32> -> vector<8x256xf32>
    %315 = arith.addf %313, %314 : vector<8x256xf32>
    %316 = arith.negf %315 : vector<8x256xf32>
    %317 = math.exp %316 : vector<8x256xf32>
    %cst_102 = arith.constant 1.000000e+00 : f32
    %318 = vector.broadcast %cst_102 : f32 to vector<8x256xf32>
    %319 = arith.addf %318, %317 : vector<8x256xf32>
    %320 = arith.divf %318, %319 : vector<8x256xf32>
    %cst_103 = arith.constant 2.000000e+00 : f32
    %321 = vector.broadcast %cst_103 : f32 to vector<8x256xf32>
    %322 = arith.mulf %321, %320 : vector<8x256xf32>
    %cst_104 = arith.constant 1.000000e+00 : f32
    %323 = vector.broadcast %cst_104 : f32 to vector<8x256xf32>
    %324 = arith.subf %322, %323 : vector<8x256xf32>
    %325 = arith.select %5, %320, %324 : vector<8x256xi1>, vector<8x256xf32>
    %326 = vector.extract_strided_slice %325 {offsets = [0, 0], sizes = [8, 64], strides = [1, 1]} : vector<8x256xf32> to vector<8x64xf32>
    %327 = vector.extract_strided_slice %325 {offsets = [0, 64], sizes = [8, 64], strides = [1, 1]} : vector<8x256xf32> to vector<8x64xf32>
    %328 = vector.extract_strided_slice %325 {offsets = [0, 128], sizes = [8, 64], strides = [1, 1]} : vector<8x256xf32> to vector<8x64xf32>
    %329 = vector.extract_strided_slice %325 {offsets = [0, 192], sizes = [8, 64], strides = [1, 1]} : vector<8x256xf32> to vector<8x64xf32>
    %330 = arith.mulf %327, %283 : vector<8x64xf32>
    %331 = arith.mulf %326, %329 : vector<8x64xf32>
    %332 = arith.addf %330, %331 : vector<8x64xf32>
    %333 = math.tanh %332 : vector<8x64xf32>
    %334 = arith.mulf %328, %333 : vector<8x64xf32>
    %c0_105 = arith.constant 0 : index
    %c0_106 = arith.constant 0 : index
    %335 = vector.load %arg3[%c0_105, %c0_106] : memref<64x256xf32, #tpu.memory_space<vmem>>, vector<64x256xf32>
    %cst_107 = arith.constant dense<0.000000e+00> : vector<8x256xf32>
    %336 = tpu.matmul %334, %335, %cst_107 {dimension_numbers = #tpu.dot_dimension_numbers<[1], [0], [0], [1], [0, 0, 1, 1], [], []>} : vector<8x64xf32>, vector<64x256xf32>, vector<8x256xf32> -> vector<8x256xf32>
    %337 = arith.addf %336, %310 : vector<8x256xf32>
    %338 = arith.addf %337, %9 : vector<8x256xf32>
    %339 = arith.negf %338 : vector<8x256xf32>
    %340 = math.exp %339 : vector<8x256xf32>
    %cst_108 = arith.constant 1.000000e+00 : f32
    %341 = vector.broadcast %cst_108 : f32 to vector<8x256xf32>
    %342 = arith.addf %341, %340 : vector<8x256xf32>
    %343 = arith.divf %341, %342 : vector<8x256xf32>
    %cst_109 = arith.constant 2.000000e+00 : f32
    %344 = vector.broadcast %cst_109 : f32 to vector<8x256xf32>
    %345 = arith.mulf %344, %343 : vector<8x256xf32>
    %cst_110 = arith.constant 1.000000e+00 : f32
    %346 = vector.broadcast %cst_110 : f32 to vector<8x256xf32>
    %347 = arith.subf %345, %346 : vector<8x256xf32>
    %348 = arith.select %5, %343, %347 : vector<8x256xi1>, vector<8x256xf32>
    %349 = vector.extract_strided_slice %348 {offsets = [0, 0], sizes = [8, 64], strides = [1, 1]} : vector<8x256xf32> to vector<8x64xf32>
    %350 = vector.extract_strided_slice %348 {offsets = [0, 64], sizes = [8, 64], strides = [1, 1]} : vector<8x256xf32> to vector<8x64xf32>
    %351 = vector.extract_strided_slice %348 {offsets = [0, 128], sizes = [8, 64], strides = [1, 1]} : vector<8x256xf32> to vector<8x64xf32>
    %352 = vector.extract_strided_slice %348 {offsets = [0, 192], sizes = [8, 64], strides = [1, 1]} : vector<8x256xf32> to vector<8x64xf32>
    %353 = arith.mulf %350, %306 : vector<8x64xf32>
    %354 = arith.mulf %349, %352 : vector<8x64xf32>
    %355 = arith.addf %353, %354 : vector<8x64xf32>
    %356 = math.tanh %355 : vector<8x64xf32>
    %357 = arith.mulf %351, %356 : vector<8x64xf32>
    %c7_i32 = arith.constant 7 : i32
    %c0_111 = arith.constant 0 : index
    %c0_112 = arith.constant 0 : index
    %358 = vector.load %arg4[%c0_111, %c0_112] : memref<64x256xf32, #tpu.memory_space<vmem>>, vector<64x256xf32>
    %cst_113 = arith.constant dense<0.000000e+00> : vector<8x256xf32>
    %359 = tpu.matmul %357, %358, %cst_113 {dimension_numbers = #tpu.dot_dimension_numbers<[1], [0], [0], [1], [0, 0, 1, 1], [], []>} : vector<8x64xf32>, vector<64x256xf32>, vector<8x256xf32> -> vector<8x256xf32>
    %360 = arith.index_cast %c7_i32 : i32 to index
    %c0_114 = arith.constant 0 : index
    %c0_115 = arith.constant 0 : index
    %361 = vector.load %arg1[%360, %c0_114, %c0_115] : memref<8x8x256xf32, #tpu.memory_space<vmem>>, vector<1x8x256xf32>
    %362 = vector.shape_cast %361 : vector<1x8x256xf32> to vector<8x256xf32>
    %cst_116 = arith.constant dense<0.000000e+00> : vector<8x256xf32>
    %363 = tpu.matmul %334, %6, %cst_116 {dimension_numbers = #tpu.dot_dimension_numbers<[1], [0], [0], [1], [0, 0, 1, 1], [], []>} : vector<8x64xf32>, vector<64x256xf32>, vector<8x256xf32> -> vector<8x256xf32>
    %364 = arith.addf %362, %363 : vector<8x256xf32>
    %365 = arith.negf %364 : vector<8x256xf32>
    %366 = math.exp %365 : vector<8x256xf32>
    %cst_117 = arith.constant 1.000000e+00 : f32
    %367 = vector.broadcast %cst_117 : f32 to vector<8x256xf32>
    %368 = arith.addf %367, %366 : vector<8x256xf32>
    %369 = arith.divf %367, %368 : vector<8x256xf32>
    %cst_118 = arith.constant 2.000000e+00 : f32
    %370 = vector.broadcast %cst_118 : f32 to vector<8x256xf32>
    %371 = arith.mulf %370, %369 : vector<8x256xf32>
    %cst_119 = arith.constant 1.000000e+00 : f32
    %372 = vector.broadcast %cst_119 : f32 to vector<8x256xf32>
    %373 = arith.subf %371, %372 : vector<8x256xf32>
    %374 = arith.select %5, %369, %373 : vector<8x256xi1>, vector<8x256xf32>
    %375 = vector.extract_strided_slice %374 {offsets = [0, 0], sizes = [8, 64], strides = [1, 1]} : vector<8x256xf32> to vector<8x64xf32>
    %376 = vector.extract_strided_slice %374 {offsets = [0, 64], sizes = [8, 64], strides = [1, 1]} : vector<8x256xf32> to vector<8x64xf32>
    %377 = vector.extract_strided_slice %374 {offsets = [0, 128], sizes = [8, 64], strides = [1, 1]} : vector<8x256xf32> to vector<8x64xf32>
    %378 = vector.extract_strided_slice %374 {offsets = [0, 192], sizes = [8, 64], strides = [1, 1]} : vector<8x256xf32> to vector<8x64xf32>
    %379 = arith.mulf %376, %332 : vector<8x64xf32>
    %380 = arith.mulf %375, %378 : vector<8x64xf32>
    %381 = arith.addf %379, %380 : vector<8x64xf32>
    %382 = math.tanh %381 : vector<8x64xf32>
    %383 = arith.mulf %377, %382 : vector<8x64xf32>
    %c0_120 = arith.constant 0 : index
    %c0_121 = arith.constant 0 : index
    %384 = vector.load %arg3[%c0_120, %c0_121] : memref<64x256xf32, #tpu.memory_space<vmem>>, vector<64x256xf32>
    %cst_122 = arith.constant dense<0.000000e+00> : vector<8x256xf32>
    %385 = tpu.matmul %383, %384, %cst_122 {dimension_numbers = #tpu.dot_dimension_numbers<[1], [0], [0], [1], [0, 0, 1, 1], [], []>} : vector<8x64xf32>, vector<64x256xf32>, vector<8x256xf32> -> vector<8x256xf32>
    %386 = arith.addf %385, %359 : vector<8x256xf32>
    %387 = arith.addf %386, %9 : vector<8x256xf32>
    %388 = arith.negf %387 : vector<8x256xf32>
    %389 = math.exp %388 : vector<8x256xf32>
    %cst_123 = arith.constant 1.000000e+00 : f32
    %390 = vector.broadcast %cst_123 : f32 to vector<8x256xf32>
    %391 = arith.addf %390, %389 : vector<8x256xf32>
    %392 = arith.divf %390, %391 : vector<8x256xf32>
    %cst_124 = arith.constant 2.000000e+00 : f32
    %393 = vector.broadcast %cst_124 : f32 to vector<8x256xf32>
    %394 = arith.mulf %393, %392 : vector<8x256xf32>
    %cst_125 = arith.constant 1.000000e+00 : f32
    %395 = vector.broadcast %cst_125 : f32 to vector<8x256xf32>
    %396 = arith.subf %394, %395 : vector<8x256xf32>
    %397 = arith.select %5, %392, %396 : vector<8x256xi1>, vector<8x256xf32>
    %398 = vector.extract_strided_slice %397 {offsets = [0, 0], sizes = [8, 64], strides = [1, 1]} : vector<8x256xf32> to vector<8x64xf32>
    %399 = vector.extract_strided_slice %397 {offsets = [0, 64], sizes = [8, 64], strides = [1, 1]} : vector<8x256xf32> to vector<8x64xf32>
    %400 = vector.extract_strided_slice %397 {offsets = [0, 128], sizes = [8, 64], strides = [1, 1]} : vector<8x256xf32> to vector<8x64xf32>
    %401 = vector.extract_strided_slice %397 {offsets = [0, 192], sizes = [8, 64], strides = [1, 1]} : vector<8x256xf32> to vector<8x64xf32>
    %402 = arith.mulf %399, %355 : vector<8x64xf32>
    %403 = arith.mulf %398, %401 : vector<8x64xf32>
    %404 = arith.addf %402, %403 : vector<8x64xf32>
    %405 = math.tanh %404 : vector<8x64xf32>
    %406 = arith.mulf %400, %405 : vector<8x64xf32>
    %c8_i32 = arith.constant 8 : i32
    %407 = tpu.concatenate %383, %381, %406, %404 in 1 : vector<8x64xf32>, vector<8x64xf32>, vector<8x64xf32>, vector<8x64xf32> -> vector<8x256xf32>
    %c0_126 = arith.constant 0 : index
    %c0_127 = arith.constant 0 : index
    %408 = vector.load %arg11[%c0_126, %c0_127] : memref<8x256xf32, #tpu.memory_space<vmem>>, vector<8x256xf32>
    tpu.vector_store %arg11[%c0_126, %c0_127], %407 {strides = array<i32>} : memref<8x256xf32, #tpu.memory_space<vmem>>, vector<8x256xf32>,
    %c0_i32_128 = arith.constant 0 : i32
    %409 = arith.cmpi eq, %arg0, %c0_i32_128 : i32
    %410 = arith.extui %409 : i1 to i32
    %c0_i32_129 = arith.constant 0 : i32
    %411 = arith.cmpi ne, %410, %c0_i32_129 : i32
    scf.if %411 {
      %c0_130 = arith.constant 0 : index
      %c0_131 = arith.constant 0 : index
      %412 = vector.load %arg6[%c0_130, %c0_131] : memref<64x32xf32, #tpu.memory_space<vmem>>, vector<64x32xf32>
      %cst_132 = arith.constant dense<0.000000e+00> : vector<8x32xf32>
      %413 = tpu.matmul %406, %412, %cst_132 {dimension_numbers = #tpu.dot_dimension_numbers<[1], [0], [0], [1], [0, 0, 1, 1], [], []>} : vector<8x64xf32>, vector<64x32xf32>, vector<8x32xf32> -> vector<8x32xf32>
      %c0_133 = arith.constant 0 : index
      %c0_134 = arith.constant 0 : index
      %414 = vector.load %arg7[%c0_133, %c0_134] : memref<1x32xf32, #tpu.memory_space<vmem>>, vector<1x32xf32>
      %415 = vector.broadcast %414 : vector<1x32xf32> to vector<8x32xf32>
      %416 = arith.addf %413, %415 : vector<8x32xf32>
      %cst_135 = arith.constant 0.000000e+00 : f32
      %417 = vector.broadcast %cst_135 : f32 to vector<8x32xf32>
      %418 = arith.maximumf %416, %417 : vector<8x32xf32>
      %c0_136 = arith.constant 0 : index
      %c0_137 = arith.constant 0 : index
      %419 = vector.load %arg8[%c0_136, %c0_137] : memref<32x128xf32, #tpu.memory_space<vmem>>, vector<32x128xf32>
      %cst_138 = arith.constant dense<0.000000e+00> : vector<8x128xf32>
      %420 = tpu.matmul %418, %419, %cst_138 {dimension_numbers = #tpu.dot_dimension_numbers<[1], [0], [0], [1], [0, 0, 1, 1], [], []>} : vector<8x32xf32>, vector<32x128xf32>, vector<8x128xf32> -> vector<8x128xf32>
      %c0_139 = arith.constant 0 : index
      %c0_140 = arith.constant 0 : index
      %421 = vector.load %arg9[%c0_139, %c0_140] : memref<1x128xf32, #tpu.memory_space<vmem>>, vector<1x128xf32>
      %422 = vector.broadcast %421 : vector<1x128xf32> to vector<8x128xf32>
      %423 = arith.addf %420, %422 : vector<8x128xf32>
      %c0_141 = arith.constant 0 : index
      %c0_142 = arith.constant 0 : index
      %424 = vector.load %arg10[%c0_141, %c0_142] : memref<8x128xf32, #tpu.memory_space<vmem>>, vector<8x128xf32>
      tpu.vector_store %arg10[%c0_141, %c0_142], %423 {strides = array<i32>} : memref<8x128xf32, #tpu.memory_space<vmem>>, vector<8x128xf32>,
    } else {
    }
    return
  }
  func.func @transform_0(%arg0: i32) -> (i32, i32, i32) {
    %c0_i32 = arith.constant 0 : i32
    %c0_i32_0 = arith.constant 0 : i32
    %c0_i32_1 = arith.constant 0 : i32
    return %arg0, %c0_i32, %c0_i32_0 : i32, i32, i32
  }
  func.func @transform_1(%arg0: i32) -> (i32, i32) {
    %c0_i32 = arith.constant 0 : i32
    %c0_i32_0 = arith.constant 0 : i32
    %c0_i32_1 = arith.constant 0 : i32
    return %c0_i32, %c0_i32_0 : i32, i32
  }
  func.func @transform_2(%arg0: i32) -> (i32, i32) {
    %c0_i32 = arith.constant 0 : i32
    %c0_i32_0 = arith.constant 0 : i32
    %c0_i32_1 = arith.constant 0 : i32
    return %c0_i32, %c0_i32_0 : i32, i32
  }
  func.func @transform_3(%arg0: i32) -> (i32, i32) {
    %c0_i32 = arith.constant 0 : i32
    %c0_i32_0 = arith.constant 0 : i32
    %c0_i32_1 = arith.constant 0 : i32
    return %c0_i32, %c0_i32_0 : i32, i32
  }
  func.func @transform_4(%arg0: i32) -> (i32, i32) {
    %c0_i32 = arith.constant 0 : i32
    %c0_i32_0 = arith.constant 0 : i32
    %c0_i32_1 = arith.constant 0 : i32
    return %c0_i32, %c0_i32_0 : i32, i32
  }
  func.func @transform_5(%arg0: i32) -> (i32, i32) {
    %c0_i32 = arith.constant 0 : i32
    %c0_i32_0 = arith.constant 0 : i32
    %c0_i32_1 = arith.constant 0 : i32
    return %c0_i32, %c0_i32_0 : i32, i32
  }
  func.func @transform_6(%arg0: i32) -> (i32, i32) {
    %c0_i32 = arith.constant 0 : i32
    %c0_i32_0 = arith.constant 0 : i32
    %c0_i32_1 = arith.constant 0 : i32
    return %c0_i32, %c0_i32_0 : i32, i32
  }
  func.func @transform_7(%arg0: i32) -> (i32, i32) {
    %c0_i32 = arith.constant 0 : i32
    %c0_i32_0 = arith.constant 0 : i32
    %c0_i32_1 = arith.constant 0 : i32
    return %c0_i32, %c0_i32_0 : i32, i32
  }
  func.func @transform_8(%arg0: i32) -> (i32, i32) {
    %c0_i32 = arith.constant 0 : i32
    %c0_i32_0 = arith.constant 0 : i32
    %c0_i32_1 = arith.constant 0 : i32
    return %c0_i32, %c0_i32_0 : i32, i32
  }
  func.func @transform_9(%arg0: i32) -> (i32, i32) {
    %c0_i32 = arith.constant 0 : i32
    %c0_i32_0 = arith.constant 0 : i32
    %c0_i32_1 = arith.constant 0 : i32
    return %c0_i32, %c0_i32_0 : i32, i32
  }
}

</mosaic_0001>

<bundles_post_ra>
// kernel: tpu_custom_call.1
= control target key start
LH: loop header
LB: loop body
LE: loop exit
PB: predicated region body
PF: predicated region fallthrough
CT: control target
= control target key end

     0   :  { %14 = vsyncpa [#allocation4], 0  ;;  %s4228_s0 = inlined_call_operand.hbm [shape: f32[8,8,256], index: 0, kind: input, shape index: {}]   ;;  %s4229_s1 = inlined_call_operand.hbm [shape: f32[64,256], index: 1, kind: input, shape index: {}]   ;;  %s4230_s2 = inlined_call_operand.hbm [shape: f32[64,256], index: 2, kind: input, shape index: {}]   ;;  %s4231_s3 = inlined_call_operand.hbm [shape: f32[64,256], index: 3, kind: input, shape index: {}]   ;;  %s4232_s4 = inlined_call_operand.vmem [shape: f32[1,256], index: 4, kind: input, shape index: {}]   ;;  %s4233_s5 = inlined_call_operand.vmem [shape: f32[64,32], index: 5, kind: input, shape index: {}]   ;;  %s4234_s6 = inlined_call_operand.vmem [shape: f32[1,32], index: 6, kind: input, shape index: {}]   ;;  %s4235_s7 = inlined_call_operand.vmem [shape: f32[32,128], index: 7, kind: input, shape index: {}]   ;;  %s4236_s8 = inlined_call_operand.vmem [shape: f32[1,128], index: 8, kind: input, shape index: {}]   ;;  %s4237_s9 = inlined_call_operand.hbm [shape: f32[8,128], index: 9, kind: output, shape index: {}]  }
   0x1   :  { %15 = vsyncpa [#allocation7], 0 }
   0x2   :  { %16 = vsyncpa [#allocation10], 0 }
   0x3   :  { %17 = vsyncpa [#allocation5], 0  ;;  %s3574_s30 = smov [#allocation6]   ;;  %s3575_s11 = smov [#allocation3]  }
   0x4   :  { %s35_s10 = sshll.u32 %s3574_s30, 4  ;;  %s23_s12 = sshll.u32 %s3575_s11, 4  ;;  %s36_s10 = int_to_ptr.vmem [resolvable:$true] %s35_s10  ;;  %s3635_s12 = int_to_ptr.vmem [resolvable:$true] %s23_s12 }
   0x5   :  { %s3456_s15 = scalar_lea.hbm %s4229_s1, 2048 }
   0x6   :  { %p3457_p0 = scmp.ne.s32.totalorder %s4229_s1, %s3456_s15  ;;  %p3460_p1 = scmp.lt.u32.totalorder %s3456_s15, %s4229_s1 }
   0x8   :  { %p3462_p2 = pnand %p3460_p1, %p3457_p0 }
   0xa   :  { %3465 = shalt.err (!%p3462_p2)
}
   0xb   :  { %s3466_s20 = scalar_lea.vmem %s36_s10, 2048  ;;  %p3471_p4 = scmp.lt.s32.totalorder %s36_s10, %s36_s10 }
   0xc   :  { %p3467_p3 = scmp.ne.s32.totalorder %s36_s10, %s3466_s20  ;;  %p3472_p5 = scmp.lt.s32.totalorder %s3466_s20, %s3466_s20 }
   0xe   :  { %p3473_p6 = por %p3472_p5, %p3471_p4 }
  0x10   :  { %p3474_p7 = pnand %p3473_p6, %p3467_p3 }
  0x12   :  { %3477 = shalt.err (!%p3474_p7)
}
  0x13   :  { %s3576_s21 = smov 256   ;;  %s3577_s22 = smov 16  }
  0x14   :  { %41 = dma.hbm_to_vmem [thread:$0]  %s4229_s1, 2048, %s36_s10, [#allocation7], %s3576_s21, %s3576_s21, %s3577_s22  }
  0x15   :  { %s3478_s27 = scalar_lea.hbm %s4228_s0, 2048 }
  0x16   :  { %p3479_p8 = scmp.ne.s32.totalorder %s4228_s0, %s3478_s27  ;;  %p3482_p9 = scmp.lt.u32.totalorder %s3478_s27, %s4228_s0 }
  0x18   :  { %p3484_p10 = pnand %p3482_p9, %p3479_p8 }
  0x1a   :  { %3487 = shalt.err (!%p3484_p10)
}
  0x1b   :  { %s3488_s13 = scalar_lea.vmem %s3635_s12, 2048  ;;  %p3493_p12 = scmp.lt.s32.totalorder %s3635_s12, %s3635_s12 }
  0x1c   :  { %p3489_p11 = scmp.ne.s32.totalorder %s3635_s12, %s3488_s13  ;;  %p3494_p13 = scmp.lt.s32.totalorder %s3488_s13, %s3488_s13 }
  0x1e   :  { %p3495_p0 = por %p3494_p13, %p3493_p12 }
  0x20   :  { %p3496_p1 = pnand %p3495_p0, %p3489_p11 }
  0x22   :  { %3499 = shalt.err (!%p3496_p1)
}
  0x23   :  { %29 = dma.hbm_to_vmem [thread:$0]  %s4228_s0, 2048, %s3635_s12, [#allocation4], %s3576_s21, %s3576_s21, %s3577_s22  }
  0x24   :  { %s3578_s14 = smov [#allocation8]   ;;  %s3579_s16 = smov [#allocation9]  }
  0x25   :  { %s47_s15 = sshll.u32 %s3578_s14, 4  ;;  %s59_s17 = sshll.u32 %s3579_s16, 4  ;;  %s48_s15 = int_to_ptr.vmem [resolvable:$true] %s47_s15  ;;  %s3672_s17 = int_to_ptr.vmem [resolvable:$true] %s59_s17 }
  0x26   :  { %s3500_s20 = scalar_lea.hbm %s4230_s2, 2048 }
  0x27   :  { %p3501_p2 = scmp.ne.s32.totalorder %s4230_s2, %s3500_s20  ;;  %p3504_p3 = scmp.lt.u32.totalorder %s3500_s20, %s4230_s2 }
  0x29   :  { %p3506_p4 = pnand %p3504_p3, %p3501_p2 }
  0x2b   :  { %3509 = shalt.err (!%p3506_p4)
}
  0x2c   :  { %s3510_s0 = scalar_lea.vmem %s48_s15, 2048  ;;  %p3515_p6 = scmp.lt.s32.totalorder %s48_s15, %s48_s15 }
  0x2d   :  { %p3511_p5 = scmp.ne.s32.totalorder %s48_s15, %s3510_s0  ;;  %p3516_p7 = scmp.lt.s32.totalorder %s3510_s0, %s3510_s0 }
  0x2f   :  { %p3517_p8 = por %p3516_p7, %p3515_p6 }
  0x31   :  { %p3518_p9 = pnand %p3517_p8, %p3511_p5 }
  0x33   :  { %3521 = shalt.err (!%p3518_p9)
}
  0x34   :  { %53 = dma.hbm_to_vmem [thread:$0]  %s4230_s2, 2048, %s48_s15, [#allocation7], %s3576_s21, %s3576_s21, %s3577_s22  }
  0x35   :  { %s3522_s30 = scalar_lea.hbm %s4231_s3, 2048 }
  0x36   :  { %p3523_p10 = scmp.ne.s32.totalorder %s4231_s3, %s3522_s30  ;;  %p3526_p11 = scmp.lt.u32.totalorder %s3522_s30, %s4231_s3 }
  0x38   :  { %p3528_p12 = pnand %p3526_p11, %p3523_p10 }
  0x3a   :  { %3531 = shalt.err (!%p3528_p12)
}
  0x3b   :  { %s3532_s14 = scalar_lea.vmem %s3672_s17, 2048  ;;  %p3537_p0 = scmp.lt.s32.totalorder %s3672_s17, %s3672_s17 }
  0x3c   :  { %p3533_p13 = scmp.ne.s32.totalorder %s3672_s17, %s3532_s14  ;;  %p3538_p1 = scmp.lt.s32.totalorder %s3532_s14, %s3532_s14 }
  0x3e   :  { %p3539_p2 = por %p3538_p1, %p3537_p0 }
  0x40   :  { %p3540_p3 = pnand %p3539_p2, %p3533_p13 }
  0x42   :  { %3543 = shalt.err (!%p3540_p3)
}
  0x43   :  { %65 = dma.hbm_to_vmem [thread:$0]  %s4231_s3, 2048, %s3672_s17, [#allocation10], %s3576_s21, %s3576_s21, %s3577_s22  }
  0x44   :  { %3566 = dma.done.wait [#allocation4], 2048  }
  0x45   :  { %3567 = vsyncadd [#allocation4], 4294965248 }
  0x46   :  { %3568 = dma.done.wait [#allocation7], 4096  }
  0x47   :  { %3569 = vsyncadd [#allocation7], 4294963200 }
  0x48   :  { %3570 = dma.done.wait [#allocation10], 2048  }
  0x49   :  { %3571 = vsyncadd [#allocation10], 4294965248  ;;  %v3580_v0 = vmov 0.0   ;;  %v100_v1 = vld [vmem:[#allocation6 + $0x8] sm:$0xff]  ;;  %v102_v2 = vld [vmem:[#allocation6 + $0x18] sm:$0xff]  ;;  %vm145_vm0 = vcmask 523264   ;;  %v94_v32 = vlaneseq }
  0x4a   :  { %289 = vmatprep.mubr.f32.mxu1 %v3580_v0  ;;  %213 = vmatprep.mubr.f32.mxu0 %v3580_v0  ;;  %v99_v3 = vld [vmem:[#allocation6] sm:$0xff]  ;;  %v3711_v4 = vpack.c.bf16 %v102_v2, %v100_v1  ;;  %v101_v5 = vld [vmem:[#allocation6 + $0x10] sm:$0xff]  ;;  %v104_v6 = vld [vmem:[#allocation6 + $0x28] sm:$0xff]  ;;  %s3581_s3 = smov 64   ;;  %vm3583_vm2 = vmmov 0   ;;  %vm2639_vm3 = vcmask 261120  }
  0x4b   :  { %v106_v7 = vld [vmem:[#allocation6 + $0x38] sm:$0xff]  ;;  %v3713_v8 = vpack.c.bf16 %v101_v5, %v99_v3  ;;  %v103_v10 = vld [vmem:[#allocation6 + $0x20] sm:$0xff]  ;;  %v105_v11 = vld [vmem:[#allocation6 + $0x30] sm:$0xff]  ;;  %v95_v33 = vand.u32 127, %v94_v32  ;;  %s3584_s16 = smov [#allocation11]  }
  0x4c   :  { %v3715_v9 = vpack.c.bf16 %v106_v7, %v104_v6  ;;  %v108_v12 = vld [vmem:[#allocation6 + $0x48] sm:$0xff]  ;;  %2884 = vmatprep.subr.bf16.mxu1 %v3711_v4  ;;  %v110_v13 = vld [vmem:[#allocation6 + $0x58] sm:$0xff]  ;;  %v3719_v14 = vpack.c.bf16 %v105_v11, %v103_v10  ;;  %v107_v16 = vld [vmem:[#allocation6 + $0x40] sm:$0xff]  ;;  %s2720_s17 = sshll.u32 %s3584_s16, 4  ;;  %s2721_s17 = int_to_ptr.vmem [resolvable:$true] %s2720_s17 }
  0x4d   :  { %2886 = vmatpush1.bf16.msra.mxu1 %v3713_v8  ;;  %v3722_v15 = vpack.c.bf16 %v110_v13, %v108_v12  ;;  %v109_v17 = vld [vmem:[#allocation6 + $0x50] sm:$0xff]  ;;  %v112_v18 = vld [vmem:[#allocation6 + $0x68] sm:$0xff]  ;;  %v114_v19 = vld [vmem:[#allocation6 + $0x78] sm:$0xff]  ;;  %v3739_v34 = vadd.s32 128, %v95_v33  ;;  %p3549_p5 = scmp.lt.s32.totalorder %s2721_s17, %s2721_s17 }
  0x4e   :  { %2888 = vmatprep.subr.bf16.mxu1 %v3715_v9  ;;  %v3725_v20 = vpack.c.bf16 %v109_v17, %v107_v16  ;;  %v3728_v21 = vpack.c.bf16 %v114_v19, %v112_v18  ;;  %v111_v22 = vld [vmem:[#allocation6 + $0x60] sm:$0xff]  ;;  %v113_v23 = vld [vmem:[#allocation6 + $0x70] sm:$0xff]  ;;  %v221_v25 = vld [vmem:[#allocation3 + $0x8] sm:$0xff] }
  0x4f   :  { %v3731_v24 = vpack.c.bf16 %v113_v23, %v111_v22  ;;  %vm98_vm1 = vcmp.lt.s32.totalorder %v3739_v34, 192  ;;  %v220_v39 = vld [vmem:[#allocation3] sm:$0xff]  ;;  %v130_v47 = vld [vmem:[#allocation9 + $0x8] sm:$0xff]  ;;  %v132_v48 = vld [vmem:[#allocation9 + $0x18] sm:$0xff] }
  0x50   :  { %v129_v49 = vld [vmem:[#allocation9] sm:$0xff]  ;;  %v3752_v50 = vpack.c.bf16 %v132_v48, %v130_v47  ;;  %v131_v51 = vld [vmem:[#allocation9 + $0x10] sm:$0xff]  ;;  %v134_v52 = vld [vmem:[#allocation9 + $0x28] sm:$0xff] }
  0x51   :  { %2890 = vmatpush1.bf16.msra.mxu1 %v3719_v14  ;;  %v136_v53 = vld [vmem:[#allocation9 + $0x38] sm:$0xff]  ;;  %v3754_v54 = vpack.c.bf16 %v131_v51, %v129_v49  ;;  %v133_v56 = vld [vmem:[#allocation9 + $0x20] sm:$0xff]  ;;  %v135_v57 = vld [vmem:[#allocation9 + $0x30] sm:$0xff] }
  0x52   :  { %2892 = vmatprep.subr.bf16.mxu1 %v3722_v15  ;;  %v3756_v55 = vpack.c.bf16 %v136_v53, %v134_v52  ;;  %v138_v58 = vld [vmem:[#allocation9 + $0x48] sm:$0xff]  ;;  %2868 = vmatprep.subr.bf16.mxu0 %v3752_v50  ;;  %v140_v59 = vld [vmem:[#allocation9 + $0x58] sm:$0xff]  ;;  %v3761_v60 = vpack.c.bf16 %v135_v57, %v133_v56  ;;  %v137_v62 = vld [vmem:[#allocation9 + $0x40] sm:$0xff] }
  0x53   :  { %2870 = vmatpush1.bf16.msra.mxu0 %v3754_v54  ;;  %v3765_v61 = vpack.c.bf16 %v140_v59, %v138_v58  ;;  %v139_v63 = vld [vmem:[#allocation9 + $0x50] sm:$0xff]  ;;  %v142_v1 = vld [vmem:[#allocation9 + $0x68] sm:$0xff]  ;;  %v144_v2 = vld [vmem:[#allocation9 + $0x78] sm:$0xff] }
  0x54   :  { %2872 = vmatprep.subr.bf16.mxu0 %v3756_v55  ;;  %v3769_v3 = vpack.c.bf16 %v139_v63, %v137_v62  ;;  %v3773_v5 = vpack.c.bf16 %v144_v2, %v142_v1  ;;  %v141_v6 = vld [vmem:[#allocation9 + $0x60] sm:$0xff]  ;;  %v143_v7 = vld [vmem:[#allocation9 + $0x70] sm:$0xff]  ;;  %v334_v10 = vld [vmem:[#allocation8 + $0x8] sm:$0xff] }
  0x55   :  { %2894 = vmatpush1.bf16.msra.mxu1 %v3725_v20  ;;  %v336_v11 = vld [vmem:[#allocation8 + $0x18] sm:$0xff]  ;;  %v3777_v12 = vpack.c.bf16 %v143_v7, %v141_v6  ;;  %v333_v16 = vld [vmem:[#allocation8] sm:$0xff]  ;;  %v335_v17 = vld [vmem:[#allocation8 + $0x10] sm:$0xff] }
  0x56   :  { %2896 = vmatprep.subr.bf16.mxu1 %v3728_v21  ;;  %v3781_v13 = vpack.c.bf16 %v336_v11, %v334_v10  ;;  %v338_v18 = vld [vmem:[#allocation8 + $0x28] sm:$0xff]  ;;  %v340_v19 = vld [vmem:[#allocation8 + $0x38] sm:$0xff]  ;;  %v3785_v22 = vpack.c.bf16 %v335_v17, %v333_v16  ;;  %v343_v33 = vld [vmem:[#allocation8 + $0x50] sm:$0xff] }
  0x57   :  { %2874 = vmatpush1.bf16.msra.mxu0 %v3761_v60  ;;  %v3789_v23 = vpack.c.bf16 %v340_v19, %v338_v18  ;;  %v115_v51 = vld [vmem:[%s4232_s4] sm:$0x3]  ;;  %v536_v59 = vld [vmem:[#allocation3 + $0x18] sm:$0xff]  ;;  %v2540_v34 = vld [vmem:[%s4233_s5 + $0x8] sm:$0xff] }
  0x58   :  { %2876 = vmatprep.subr.bf16.mxu0 %v3765_v61 }
  0x59   :  { %2898 = vmatpush1.bf16.msra.mxu1 %v3731_v24 }
  0x5a   :  { %2916 = vmatprep.subr.bf16.mxu1 %v3752_v50 }
  0x5b   :  { %2878 = vmatpush1.bf16.msra.mxu0 %v3769_v3 }
  0x5c   :  { %2732 = vmatmul.mubr.msk.f32.vlgmr.msra.gmra.mrb[0].mxu1 %vm145_vm0, %v3580_v0  ;;  %2880 = vmatprep.subr.bf16.mxu0 %v3773_v5 }
  0x5d   :  { %527 = vmatprep.mubr.f32.mxu1 %v3580_v0  ;;  %2918 = vmatpush1.bf16.msra.mxu1 %v3754_v54 }
  0x5e   :  { %2920 = vmatprep.subr.bf16.mxu1 %v3756_v55 }
  0x5f   :  { %2882 = vmatpush1.bf16.msra.mxu0 %v3777_v12 }
  0x60   :  { %2900 = vmatprep.subr.bf16.mxu0 %v3781_v13 }
  0x61   :  { %2922 = vmatpush1.bf16.msra.mxu1 %v3761_v60 }
  0x62   :  { %2924 = vmatprep.subr.bf16.mxu1 %v3765_v61  ;;  %2731 = vmatmul.mubr.msk.f32.vlgmr.msra.gmra.mrb[0].mxu0 %vm145_vm0, %v3580_v0 }
  0x63   :  { %2902 = vmatpush1.bf16.msra.mxu0 %v3785_v22  ;;  %416 = vmatprep.mubr.f32.mxu0 %v3580_v0 }
  0x64   :  { %2904 = vmatprep.subr.bf16.mxu0 %v3789_v23 }
  0x65   :  { %2926 = vmatpush1.bf16.msra.mxu1 %v3769_v3 }
  0x66   :  { %2928 = vmatprep.subr.bf16.mxu1 %v3773_v5 }
  0x69   :  { %2930 = vmatpush1.bf16.msra.mxu1 %v3777_v12 }
  0x6a   :  { %2948 = vmatprep.subr.bf16.mxu1 %v3781_v13 }
 0x12f   :  { %v291_v26 = vpop.f32.mrb[0].mxu1 }
 0x130   :  { %v293_v27 = vpop.f32.mrb[1].mxu1  ;;  %v296_v40 = vadd.f32 %v291_v26, %v220_v39  ;;  %v339_v26 = vld [vmem:[#allocation8 + $0x30] sm:$0xff] }
 0x131   :  { %v297_v28 = vadd.f32 %v293_v27, %v221_v25  ;;  %v337_v25 = vld [vmem:[#allocation8 + $0x20] sm:$0xff]  ;;  %v342_v27 = vld [vmem:[#allocation8 + $0x48] sm:$0xff] }
 0x132   :  { %v2733_v41 = vmul.f32 -1.442695, %v296_v40  ;;  %v345_v40 = vld [vmem:[#allocation8 + $0x60] sm:$0xff] }
 0x133   :  { %v2734_v29 = vmul.f32 -1.442695, %v297_v28  ;;  %v344_v28 = vld [vmem:[#allocation8 + $0x58] sm:$0xff] }
 0x135   :  { %3296 = vpow2.f32 %v2734_v29  ;;  %v3795_v29 = vpack.c.bf16 %v339_v26, %v337_v25 }
 0x137   :  { %2906 = vmatpush1.bf16.msra.mxu0 %v3795_v29 }
 0x13f   :  { %v3297_v30 = vpop.eup %3296 }
 0x140   :  { %v305_v31 = vadd.f32 1.0, %v3297_v30  ;;  %v3799_v30 = vpack.c.bf16 %v344_v28, %v342_v27 }
 0x142   :  { %3298 = vrcp.f32 %v305_v31  ;;  %v341_v31 = vld [vmem:[#allocation8 + $0x40] sm:$0xff]  ;;  %2908 = vmatprep.subr.bf16.mxu0 %v3799_v30 }
 0x143   :  { %3300 = vpow2.f32 %v2733_v41  ;;  %v347_v41 = vld [vmem:[#allocation8 + $0x70] sm:$0xff] }
 0x14c   :  { %v3299_v35 = vpop.eup %3298 }
 0x14d   :  { %v311_v36 = vmul.f32 2.0, %v3299_v35  ;;  %v3301_v42 = vpop.eup %3300 }
 0x14e   :  { %v304_v43 = vadd.f32 1.0, %v3301_v42  ;;  %v3808_v42 = vpack.c.bf16 %v347_v41, %v345_v40 }
 0x14f   :  { %v2736_v37 = vadd.f32 -1.0, %v311_v36  ;;  %v348_v36 = vld [vmem:[#allocation8 + $0x78] sm:$0xff] }
 0x150   :  { %3302 = vrcp.f32 %v304_v43 }
 0x151   :  { %v3744_v38 = vsel %vm98_vm1, %v3299_v35, %v2736_v37  ;;  %v346_v35 = vld [vmem:[#allocation8 + $0x68] sm:$0xff]  ;;  %v3802_v37 = vpack.c.bf16 %v343_v33, %v341_v31 }
 0x152   :  { %318 = vrot.lane.b32.xlu0 %v3744_v38, %s3581_s3  ;;  %v3805_v39 = vpack.c.bf16 %v348_v36, %v346_v35  ;;  %v535_v36 = vld [vmem:[#allocation3 + $0x10] sm:$0xff] }
 0x153   :  { %2910 = vmatpush1.bf16.msra.mxu0 %v3802_v37 }
 0x154   :  { %2912 = vmatprep.subr.bf16.mxu0 %v3805_v39 }
 0x157   :  { %2914 = vmatpush1.bf16.msra.mxu0 %v3808_v42 }
 0x158   :  { %2932 = vmatprep.subr.bf16.mxu0 %v3711_v4 }
 0x15a   :  { %v3748_v44 = vpop.eup %3302 }
 0x15b   :  { %v316_v43 = vmul.f32 0.0, %v3748_v44 }
 0x1c4   :  { %v319_v45 = vpop.permute.xlu0 %318 }
 0x1c5   :  { %v321_v46 = vmul.f32 %v3748_v44, %v319_v45 }
 0x1c7   :  { %323 = vrot.lane.b32.xlu0 %v321_v46, %s3581_s3 }
 0x239   :  { %v324_v45 = vpop.permute.xlu0 %323 }
 0x23a   :  { %v3814_v46 = vadd.f32 %v324_v45, %v316_v43 }
 0x23c   :  { %3304 = vtanh.f32 %v3814_v46 }
 0x246   :  { %v3305_v47 = vpop.eup %3304 }
 0x247   :  { %329 = vrot.lane.b32.xlu1 %v3305_v47, %s3581_s3 }
 0x2b9   :  { %v330_v48 = vpop.permute.xlu1 %329 }
 0x2ba   :  { %v332_v49 = vmul.f32 %v330_v48, %v3744_v38  ;;  %v118_v38 = vshrl.u32 %v94_v32, 7 }
 0x2bc   :  { %2737 = vmatmul.mubr.msk.f32.vlgmr.msra.gmra.mrb[0].mxu0 %vm145_vm0, %v332_v49  ;;  %v123_v44 = vsub.s32 1, %v118_v38  ;;  %v119_v28 = vsub.s32 0, %v118_v38 }
 0x2bd   :  { %2934 = vmatpush1.bf16.msra.mxu0 %v3713_v8  ;;  %601 = vmatprep.mubr.f32.mxu0 %v3580_v0 }
 0x2be   :  { %2936 = vmatprep.subr.bf16.mxu0 %v3715_v9  ;;  %v3843_v52 = vrot.slane %v115_v51, %v123_v44  ;;  %v3852_v31 = vrot.slane %v115_v51, %v119_v28 }
 0x2c1   :  { %2938 = vmatpush1.bf16.msra.mxu0 %v3719_v14 }
 0x2c2   :  { %2940 = vmatprep.subr.bf16.mxu0 %v3722_v15 }
 0x2c5   :  { %2942 = vmatpush1.bf16.msra.mxu0 %v3725_v20 }
 0x2c6   :  { %2944 = vmatprep.subr.bf16.mxu0 %v3728_v21 }
 0x2c9   :  { %2946 = vmatpush1.bf16.msra.mxu0 %v3731_v24 }
 0x2ca   :  { %2964 = vmatprep.subr.bf16.mxu0 %v3752_v50 }
 0x2cc   :  { %2743 = vmatmul.mubr.msk.f32.vlgmr.msra.gmra.mrb[2].mxu0 %vm145_vm0, %v332_v49 }
 0x2cd   :  { %2966 = vmatpush1.bf16.msra.mxu0 %v3754_v54  ;;  %823 = vmatprep.mubr.f32.mxu0 %v3580_v0 }
 0x2ce   :  { %2968 = vmatprep.subr.bf16.mxu0 %v3756_v55 }
 0x2d1   :  { %2970 = vmatpush1.bf16.msra.mxu0 %v3761_v60 }
 0x2d2   :  { %2972 = vmatprep.subr.bf16.mxu0 %v3765_v61 }
 0x2d5   :  { %2974 = vmatpush1.bf16.msra.mxu0 %v3769_v3 }
 0x2d6   :  { %2976 = vmatprep.subr.bf16.mxu0 %v3773_v5 }
 0x2d9   :  { %2978 = vmatpush1.bf16.msra.mxu0 %v3777_v12 }
 0x2da   :  { %2996 = vmatprep.subr.bf16.mxu0 %v3781_v13 }
 0x38f   :  { %v418_v53 = vpop.f32.mrb[0].mxu0 }
 0x390   :  { %v420_v56 = vpop.f32.mrb[1].mxu0  ;;  %v423_v33 = vadd.f32 %v418_v53, %v3852_v31 }
 0x391   :  { %v424_v57 = vadd.f32 %v420_v56, %v3843_v52 }
 0x392   :  { %v2738_v35 = vmul.f32 -1.442695, %v423_v33 }
 0x393   :  { %v2739_v58 = vmul.f32 -1.442695, %v424_v57 }
 0x395   :  { %3306 = vpow2.f32 %v2739_v58 }
 0x39f   :  { %v3307_v62 = vpop.eup %3306  ;;  %v603_v63 = vpop.f32.mrb[2].mxu0 }
 0x3a0   :  { %v432_v1 = vadd.f32 1.0, %v3307_v62  ;;  %v605_v2 = vpop.f32.mrb[3].mxu0  ;;  %v608_v40 = vadd.f32 %v603_v63, %v535_v36 }
 0x3a1   :  { %v609_v6 = vadd.f32 %v605_v2, %v536_v59 }
 0x3a2   :  { %3308 = vrcp.f32 %v432_v1  ;;  %v2744_v43 = vmul.f32 -1.442695, %v608_v40 }
 0x3a3   :  { %v2745_v32 = vmul.f32 -1.442695, %v609_v6 }
 0x3a5   :  { %3310 = vpow2.f32 %v2745_v32 }
 0x3ac   :  { %v3309_v7 = vpop.eup %3308 }
 0x3ad   :  { %v438_v10 = vmul.f32 2.0, %v3309_v7 }
 0x3af   :  { %v3311_v11 = vpop.eup %3310  ;;  %v2741_v16 = vadd.f32 -1.0, %v438_v10 }
 0x3b0   :  { %v617_v17 = vadd.f32 1.0, %v3311_v11 }
 0x3b1   :  { %v442_v18 = vsel %vm98_vm1, %v3309_v7, %v2741_v16 }
 0x3b2   :  { %3312 = vrcp.f32 %v617_v17  ;;  %445 = vrot.lane.b32.xlu1 %v442_v18, %s3581_s3 }
 0x3b3   :  { %3314 = vpow2.f32 %v2738_v35 }
 0x3b4   :  { %3316 = vpow2.f32 %v2744_v43 }
 0x3bc   :  { %v3313_v19 = vpop.eup %3312 }
 0x3bd   :  { %v623_v25 = vmul.f32 2.0, %v3313_v19  ;;  %v3315_v41 = vpop.eup %3314 }
 0x3be   :  { %v431_v45 = vadd.f32 1.0, %v3315_v41  ;;  %v3317_v47 = vpop.eup %3316 }
 0x3bf   :  { %v2747_v26 = vadd.f32 -1.0, %v623_v25  ;;  %v616_v56 = vadd.f32 1.0, %v3317_v47 }
 0x3c0   :  { %3318 = vrcp.f32 %v431_v45 }
 0x3c1   :  { %v627_v27 = vsel %vm98_vm1, %v3313_v19, %v2747_v26  ;;  %3320 = vrcp.f32 %v616_v56  ;;  %v832_v19 = vld [vmem:[#allocation3 + $0x28] sm:$0xff] }
 0x3c2   :  { %630 = vrot.lane.b32.xlu0 %v627_v27, %s3581_s3 }
 0x3ca   :  { %v3319_v48 = vpop.eup %3318 }
 0x3cb   :  { %v3321_v38 = vpop.eup %3320  ;;  %v443_v57 = vmul.f32 0.0, %v3319_v48 }
 0x3cc   :  { %v628_v63 = vmul.f32 %v3321_v38, %v3814_v46 }
 0x424   :  { %v446_v49 = vpop.permute.xlu1 %445 }
 0x425   :  { %v448_v44 = vmul.f32 %v3319_v48, %v446_v49 }
 0x427   :  { %450 = vrot.lane.b32.xlu1 %v448_v44, %s3581_s3 }
 0x434   :  { %v631_v51 = vpop.permute.xlu0 %630 }
 0x435   :  { %v633_v53 = vmul.f32 %v3321_v38, %v631_v51 }
 0x437   :  { %635 = vrot.lane.b32.xlu0 %v633_v53, %s3581_s3  ;;  %v831_v53 = vld [vmem:[#allocation3 + $0x20] sm:$0xff] }
 0x499   :  { %v451_v58 = vpop.permute.xlu1 %450 }
 0x49a   :  { %v3857_v59 = vadd.f32 %v451_v58, %v443_v57 }
 0x49c   :  { %3322 = vtanh.f32 %v3857_v59 }
 0x4a6   :  { %v3323_v62 = vpop.eup %3322 }
 0x4a7   :  { %456 = vrot.lane.b32.xlu1 %v3323_v62, %s3581_s3 }
 0x4a9   :  { %v636_v1 = vpop.permute.xlu0 %635 }
 0x4aa   :  { %v3862_v2 = vadd.f32 %v636_v1, %v628_v63 }
 0x4ac   :  { %3324 = vtanh.f32 %v3862_v2 }
 0x4b6   :  { %v3325_v6 = vpop.eup %3324 }
 0x4b7   :  { %641 = vrot.lane.b32.xlu0 %v3325_v6, %s3581_s3 }
 0x519   :  { %v457_v32 = vpop.permute.xlu1 %456 }
 0x51a   :  { %v459_v7 = vmul.f32 %v457_v32, %v442_v18 }
 0x51c   :  { %2742 = vmatmul.mubr.msk.f32.vlgmr.msra.gmra.mrb[2].mxu1 %vm145_vm0, %v459_v7 }
 0x51d   :  { %2950 = vmatpush1.bf16.msra.mxu1 %v3785_v22  ;;  %712 = vmatprep.mubr.f32.mxu1 %v3580_v0 }
 0x51e   :  { %2952 = vmatprep.subr.bf16.mxu1 %v3789_v23 }
 0x521   :  { %2954 = vmatpush1.bf16.msra.mxu1 %v3795_v29 }
 0x522   :  { %2956 = vmatprep.subr.bf16.mxu1 %v3799_v30 }
 0x525   :  { %2958 = vmatpush1.bf16.msra.mxu1 %v3802_v37 }
 0x526   :  { %2960 = vmatprep.subr.bf16.mxu1 %v3805_v39 }
 0x529   :  { %v642_v46 = vpop.permute.xlu0 %641  ;;  %2962 = vmatpush1.bf16.msra.mxu1 %v3808_v42 }
 0x52a   :  { %v644_v10 = vmul.f32 %v642_v46, %v627_v27  ;;  %2980 = vmatprep.subr.bf16.mxu1 %v3711_v4 }
 0x52c   :  { %2748 = vmatmul.mubr.msk.f32.vlgmr.msra.gmra.mrb[2].mxu1 %vm145_vm0, %v644_v10 }
 0x52d   :  { %2982 = vmatpush1.bf16.msra.mxu1 %v3713_v8  ;;  %897 = vmatprep.mubr.f32.mxu1 %v3580_v0 }
 0x52e   :  { %2984 = vmatprep.subr.bf16.mxu1 %v3715_v9 }
 0x531   :  { %2986 = vmatpush1.bf16.msra.mxu1 %v3719_v14 }
 0x532   :  { %2988 = vmatprep.subr.bf16.mxu1 %v3722_v15 }
 0x535   :  { %2990 = vmatpush1.bf16.msra.mxu1 %v3725_v20 }
 0x536   :  { %2992 = vmatprep.subr.bf16.mxu1 %v3728_v21 }
 0x539   :  { %2994 = vmatpush1.bf16.msra.mxu1 %v3731_v24 }
 0x53a   :  { %3012 = vmatprep.subr.bf16.mxu1 %v3752_v50 }
 0x53c   :  { %2754 = vmatmul.mubr.msk.f32.vlgmr.msra.gmra.mrb[4].mxu1 %vm145_vm0, %v644_v10 }
 0x53d   :  { %3014 = vmatpush1.bf16.msra.mxu1 %v3754_v54  ;;  %1119 = vmatprep.mubr.f32.mxu1 %v3580_v0 }
 0x53e   :  { %3016 = vmatprep.subr.bf16.mxu1 %v3756_v55 }
 0x541   :  { %3018 = vmatpush1.bf16.msra.mxu1 %v3761_v60 }
 0x542   :  { %3020 = vmatprep.subr.bf16.mxu1 %v3765_v61 }
 0x545   :  { %3022 = vmatpush1.bf16.msra.mxu1 %v3769_v3 }
 0x546   :  { %3024 = vmatprep.subr.bf16.mxu1 %v3773_v5 }
 0x549   :  { %3026 = vmatpush1.bf16.msra.mxu1 %v3777_v12 }
 0x54a   :  { %3044 = vmatprep.subr.bf16.mxu1 %v3781_v13 }
 0x5ff   :  { %v714_v11 = vpop.f32.mrb[2].mxu1 }
 0x600   :  { %v716_v16 = vpop.f32.mrb[3].mxu1  ;;  %v719_v38 = vadd.f32 %v714_v11, %v3852_v31 }
 0x601   :  { %v720_v17 = vadd.f32 %v716_v16, %v3843_v52 }
 0x602   :  { %v2749_v51 = vmul.f32 -1.442695, %v719_v38 }
 0x603   :  { %v2750_v18 = vmul.f32 -1.442695, %v720_v17 }
 0x605   :  { %3326 = vpow2.f32 %v2750_v18 }
 0x60f   :  { %v3327_v25 = vpop.eup %3326  ;;  %v899_v26 = vpop.f32.mrb[4].mxu1 }
 0x610   :  { %v728_v27 = vadd.f32 1.0, %v3327_v25  ;;  %v901_v28 = vpop.f32.mrb[5].mxu1  ;;  %v904_v57 = vadd.f32 %v899_v26, %v831_v53 }
 0x611   :  { %v905_v33 = vadd.f32 %v901_v28, %v832_v19 }
 0x612   :  { %3328 = vrcp.f32 %v728_v27  ;;  %v2755_v62 = vmul.f32 -1.442695, %v904_v57 }
 0x613   :  { %v2756_v35 = vmul.f32 -1.442695, %v905_v33 }
 0x615   :  { %3330 = vpow2.f32 %v2756_v35 }
 0x61c   :  { %v3329_v36 = vpop.eup %3328 }
 0x61d   :  { %v734_v40 = vmul.f32 2.0, %v3329_v36 }
 0x61f   :  { %v3331_v41 = vpop.eup %3330  ;;  %v2752_v43 = vadd.f32 -1.0, %v734_v40 }
 0x620   :  { %v913_v45 = vadd.f32 1.0, %v3331_v41 }
 0x621   :  { %v738_v47 = vsel %vm98_vm1, %v3329_v36, %v2752_v43 }
 0x622   :  { %3332 = vrcp.f32 %v913_v45  ;;  %741 = vrot.lane.b32.xlu1 %v738_v47, %s3581_s3 }
 0x623   :  { %3334 = vpow2.f32 %v2749_v51 }
 0x624   :  { %3336 = vpow2.f32 %v2755_v62 }
 0x62c   :  { %v3333_v48 = vpop.eup %3332 }
 0x62d   :  { %v919_v49 = vmul.f32 2.0, %v3333_v48  ;;  %v3335_v58 = vpop.eup %3334 }
 0x62e   :  { %v727_v63 = vadd.f32 1.0, %v3335_v58  ;;  %v3337_v1 = vpop.eup %3336 }
 0x62f   :  { %v2758_v44 = vadd.f32 -1.0, %v919_v49  ;;  %v912_v46 = vadd.f32 1.0, %v3337_v1 }
 0x630   :  { %3338 = vrcp.f32 %v727_v63 }
 0x631   :  { %v923_v56 = vsel %vm98_vm1, %v3333_v48, %v2758_v44  ;;  %3340 = vrcp.f32 %v912_v46 }
 0x632   :  { %926 = vrot.lane.b32.xlu0 %v923_v56, %s3581_s3 }
 0x63a   :  { %v3339_v6 = vpop.eup %3338 }
 0x63b   :  { %v3341_v10 = vpop.eup %3340  ;;  %v739_v17 = vmul.f32 %v3339_v6, %v3857_v59 }
 0x63c   :  { %v924_v26 = vmul.f32 %v3341_v10, %v3862_v2 }
 0x694   :  { %v742_v32 = vpop.permute.xlu1 %741 }
 0x695   :  { %v744_v7 = vmul.f32 %v3339_v6, %v742_v32 }
 0x697   :  { %746 = vrot.lane.b32.xlu1 %v744_v7, %s3581_s3 }
 0x6a4   :  { %v927_v16 = vpop.permute.xlu0 %926 }
 0x6a5   :  { %v929_v11 = vmul.f32 %v3341_v10, %v927_v16 }
 0x6a7   :  { %931 = vrot.lane.b32.xlu0 %v929_v11, %s3581_s3  ;;  %v1127_v11 = vld [vmem:[#allocation3 + $0x30] sm:$0xff] }
 0x709   :  { %v747_v18 = vpop.permute.xlu1 %746 }
 0x70a   :  { %v3907_v19 = vadd.f32 %v747_v18, %v739_v17 }
 0x70c   :  { %3342 = vtanh.f32 %v3907_v19 }
 0x716   :  { %v3343_v25 = vpop.eup %3342 }
 0x717   :  { %752 = vrot.lane.b32.xlu1 %v3343_v25, %s3581_s3 }
 0x719   :  { %v932_v27 = vpop.permute.xlu0 %931 }
 0x71a   :  { %v3912_v28 = vadd.f32 %v932_v27, %v924_v26 }
 0x71c   :  { %3344 = vtanh.f32 %v3912_v28 }
 0x726   :  { %v3345_v33 = vpop.eup %3344 }
 0x727   :  { %937 = vrot.lane.b32.xlu0 %v3345_v33, %s3581_s3 }
 0x789   :  { %v753_v35 = vpop.permute.xlu1 %752 }
 0x78a   :  { %v755_v59 = vmul.f32 %v753_v35, %v738_v47  ;;  %v1128_v47 = vld [vmem:[#allocation3 + $0x38] sm:$0xff] }
 0x78c   :  { %2753 = vmatmul.mubr.msk.f32.vlgmr.msra.gmra.mrb[4].mxu0 %vm145_vm0, %v755_v59 }
 0x78d   :  { %2998 = vmatpush1.bf16.msra.mxu0 %v3785_v22  ;;  %1008 = vmatprep.mubr.f32.mxu0 %v3580_v0 }
 0x78e   :  { %3000 = vmatprep.subr.bf16.mxu0 %v3789_v23 }
 0x791   :  { %3002 = vmatpush1.bf16.msra.mxu0 %v3795_v29 }
 0x792   :  { %3004 = vmatprep.subr.bf16.mxu0 %v3799_v30 }
 0x795   :  { %3006 = vmatpush1.bf16.msra.mxu0 %v3802_v37 }
 0x796   :  { %3008 = vmatprep.subr.bf16.mxu0 %v3805_v39 }
 0x799   :  { %3010 = vmatpush1.bf16.msra.mxu0 %v3808_v42  ;;  %v938_v2 = vpop.permute.xlu0 %937 }
 0x79a   :  { %v940_v36 = vmul.f32 %v938_v2, %v923_v56  ;;  %3028 = vmatprep.subr.bf16.mxu0 %v3711_v4 }
 0x79c   :  { %2759 = vmatmul.mubr.msk.f32.vlgmr.msra.gmra.mrb[4].mxu0 %vm145_vm0, %v940_v36 }
 0x79d   :  { %3030 = vmatpush1.bf16.msra.mxu0 %v3713_v8  ;;  %1193 = vmatprep.mubr.f32.mxu0 %v3580_v0 }
 0x79e   :  { %3032 = vmatprep.subr.bf16.mxu0 %v3715_v9 }
 0x7a1   :  { %3034 = vmatpush1.bf16.msra.mxu0 %v3719_v14 }
 0x7a2   :  { %3036 = vmatprep.subr.bf16.mxu0 %v3722_v15 }
 0x7a5   :  { %3038 = vmatpush1.bf16.msra.mxu0 %v3725_v20 }
 0x7a6   :  { %3040 = vmatprep.subr.bf16.mxu0 %v3728_v21 }
 0x7a9   :  { %3042 = vmatpush1.bf16.msra.mxu0 %v3731_v24 }
 0x7aa   :  { %3060 = vmatprep.subr.bf16.mxu0 %v3752_v50 }
 0x7ac   :  { %2765 = vmatmul.mubr.msk.f32.vlgmr.msra.gmra.mrb[6].mxu0 %vm145_vm0, %v940_v36 }
 0x7ad   :  { %3062 = vmatpush1.bf16.msra.mxu0 %v3754_v54  ;;  %1415 = vmatprep.mubr.f32.mxu0 %v3580_v0 }
 0x7ae   :  { %3064 = vmatprep.subr.bf16.mxu0 %v3756_v55 }
 0x7b1   :  { %3066 = vmatpush1.bf16.msra.mxu0 %v3761_v60 }
 0x7b2   :  { %3068 = vmatprep.subr.bf16.mxu0 %v3765_v61 }
 0x7b5   :  { %3070 = vmatpush1.bf16.msra.mxu0 %v3769_v3 }
 0x7b6   :  { %3072 = vmatprep.subr.bf16.mxu0 %v3773_v5 }
 0x7b9   :  { %3074 = vmatpush1.bf16.msra.mxu0 %v3777_v12 }
 0x7ba   :  { %3092 = vmatprep.subr.bf16.mxu0 %v3781_v13 }
 0x86f   :  { %v1010_v40 = vpop.f32.mrb[4].mxu0 }
 0x870   :  { %v1012_v41 = vpop.f32.mrb[5].mxu0  ;;  %v1015_v10 = vadd.f32 %v1010_v40, %v3852_v31 }
 0x871   :  { %v1016_v43 = vadd.f32 %v1012_v41, %v3843_v52 }
 0x872   :  { %v2760_v16 = vmul.f32 -1.442695, %v1015_v10 }
 0x873   :  { %v2761_v45 = vmul.f32 -1.442695, %v1016_v43 }
 0x875   :  { %3346 = vpow2.f32 %v2761_v45 }
 0x87f   :  { %v3347_v48 = vpop.eup %3346  ;;  %v1195_v49 = vpop.f32.mrb[6].mxu0 }
 0x880   :  { %v1024_v44 = vadd.f32 1.0, %v3347_v48  ;;  %v1197_v56 = vpop.f32.mrb[7].mxu0  ;;  %v1200_v17 = vadd.f32 %v1195_v49, %v1127_v11 }
 0x881   :  { %v1201_v38 = vadd.f32 %v1197_v56, %v1128_v47 }
 0x882   :  { %3348 = vrcp.f32 %v1024_v44  ;;  %v2766_v25 = vmul.f32 -1.442695, %v1200_v17 }
 0x883   :  { %v2767_v51 = vmul.f32 -1.442695, %v1201_v38 }
 0x885   :  { %3350 = vpow2.f32 %v2767_v51 }
 0x88c   :  { %v3349_v53 = vpop.eup %3348 }
 0x88d   :  { %v1030_v57 = vmul.f32 2.0, %v3349_v53 }
 0x88f   :  { %v3351_v58 = vpop.eup %3350  ;;  %v2763_v62 = vadd.f32 -1.0, %v1030_v57 }
 0x890   :  { %v1209_v63 = vadd.f32 1.0, %v3351_v58 }
 0x891   :  { %v1034_v1 = vsel %vm98_vm1, %v3349_v53, %v2763_v62 }
 0x892   :  { %3352 = vrcp.f32 %v1209_v63  ;;  %1037 = vrot.lane.b32.xlu1 %v1034_v1, %s3581_s3 }
 0x893   :  { %3354 = vpow2.f32 %v2760_v16 }
 0x894   :  { %3356 = vpow2.f32 %v2766_v25 }
 0x89c   :  { %v3353_v6 = vpop.eup %3352 }
 0x89d   :  { %v1215_v32 = vmul.f32 2.0, %v3353_v6  ;;  %v3355_v18 = vpop.eup %3354 }
 0x89e   :  { %v1023_v26 = vadd.f32 1.0, %v3355_v18  ;;  %v3357_v27 = vpop.eup %3356 }
 0x89f   :  { %v2769_v7 = vadd.f32 -1.0, %v1215_v32  ;;  %v1208_v2 = vadd.f32 1.0, %v3357_v27 }
 0x8a0   :  { %3358 = vrcp.f32 %v1023_v26 }
 0x8a1   :  { %v1219_v46 = vsel %vm98_vm1, %v3353_v6, %v2769_v7  ;;  %3360 = vrcp.f32 %v1208_v2 }
 0x8a2   :  { %1222 = vrot.lane.b32.xlu0 %v1219_v46, %s3581_s3 }
 0x8aa   :  { %v3359_v33 = vpop.eup %3358 }
 0x8ab   :  { %v3361_v36 = vpop.eup %3360  ;;  %v1035_v43 = vmul.f32 %v3359_v33, %v3907_v19 }
 0x8ac   :  { %v1220_v49 = vmul.f32 %v3361_v36, %v3912_v28 }
 0x904   :  { %v1038_v35 = vpop.permute.xlu1 %1037 }
 0x905   :  { %v1040_v59 = vmul.f32 %v3359_v33, %v1038_v35 }
 0x907   :  { %1042 = vrot.lane.b32.xlu1 %v1040_v59, %s3581_s3 }
 0x914   :  { %v1223_v41 = vpop.permute.xlu0 %1222 }
 0x915   :  { %v1225_v40 = vmul.f32 %v3361_v36, %v1223_v41 }
 0x917   :  { %1227 = vrot.lane.b32.xlu0 %v1225_v40, %s3581_s3  ;;  %v1423_v40 = vld [vmem:[#allocation3 + $0x40] sm:$0xff] }
 0x979   :  { %v1043_v45 = vpop.permute.xlu1 %1042 }
 0x97a   :  { %v3957_v47 = vadd.f32 %v1043_v45, %v1035_v43 }
 0x97c   :  { %3362 = vtanh.f32 %v3957_v47 }
 0x986   :  { %v3363_v48 = vpop.eup %3362 }
 0x987   :  { %1048 = vrot.lane.b32.xlu1 %v3363_v48, %s3581_s3 }
 0x989   :  { %v1228_v44 = vpop.permute.xlu0 %1227 }
 0x98a   :  { %v3962_v56 = vadd.f32 %v1228_v44, %v1220_v49 }
 0x98c   :  { %3364 = vtanh.f32 %v3962_v56 }
 0x996   :  { %v3365_v38 = vpop.eup %3364 }
 0x997   :  { %1233 = vrot.lane.b32.xlu0 %v3365_v38, %s3581_s3 }
 0x9f9   :  { %v1049_v51 = vpop.permute.xlu1 %1048 }
 0x9fa   :  { %v1051_v19 = vmul.f32 %v1049_v51, %v1034_v1  ;;  %v1424_v1 = vld [vmem:[#allocation3 + $0x48] sm:$0xff] }
 0x9fc   :  { %2764 = vmatmul.mubr.msk.f32.vlgmr.msra.gmra.mrb[6].mxu1 %vm145_vm0, %v1051_v19 }
 0x9fd   :  { %3046 = vmatpush1.bf16.msra.mxu1 %v3785_v22  ;;  %1304 = vmatprep.mubr.f32.mxu1 %v3580_v0 }
 0x9fe   :  { %3048 = vmatprep.subr.bf16.mxu1 %v3789_v23 }
 0xa01   :  { %3050 = vmatpush1.bf16.msra.mxu1 %v3795_v29 }
 0xa02   :  { %3052 = vmatprep.subr.bf16.mxu1 %v3799_v30 }
 0xa05   :  { %3054 = vmatpush1.bf16.msra.mxu1 %v3802_v37 }
 0xa06   :  { %3056 = vmatprep.subr.bf16.mxu1 %v3805_v39 }
 0xa09   :  { %v1234_v28 = vpop.permute.xlu0 %1233  ;;  %3058 = vmatpush1.bf16.msra.mxu1 %v3808_v42 }
 0xa0a   :  { %v1236_v53 = vmul.f32 %v1234_v28, %v1219_v46  ;;  %3076 = vmatprep.subr.bf16.mxu1 %v3711_v4 }
 0xa0c   :  { %2770 = vmatmul.mubr.msk.f32.vlgmr.msra.gmra.mrb[6].mxu1 %vm145_vm0, %v1236_v53 }
 0xa0d   :  { %3078 = vmatpush1.bf16.msra.mxu1 %v3713_v8  ;;  %1489 = vmatprep.mubr.f32.mxu1 %v3580_v0 }
 0xa0e   :  { %3080 = vmatprep.subr.bf16.mxu1 %v3715_v9 }
 0xa11   :  { %3082 = vmatpush1.bf16.msra.mxu1 %v3719_v14 }
 0xa12   :  { %3084 = vmatprep.subr.bf16.mxu1 %v3722_v15 }
 0xa15   :  { %3086 = vmatpush1.bf16.msra.mxu1 %v3725_v20 }
 0xa16   :  { %3088 = vmatprep.subr.bf16.mxu1 %v3728_v21 }
 0xa19   :  { %3090 = vmatpush1.bf16.msra.mxu1 %v3731_v24 }
 0xa1a   :  { %3108 = vmatprep.subr.bf16.mxu1 %v3752_v50 }
 0xa1c   :  { %2776 = vmatmul.mubr.msk.f32.vlgmr.msra.gmra.mrb[8].mxu1 %vm145_vm0, %v1236_v53 }
 0xa1d   :  { %3110 = vmatpush1.bf16.msra.mxu1 %v3754_v54  ;;  %1711 = vmatprep.mubr.f32.mxu1 %v3580_v0 }
 0xa1e   :  { %3112 = vmatprep.subr.bf16.mxu1 %v3756_v55 }
 0xa21   :  { %3114 = vmatpush1.bf16.msra.mxu1 %v3761_v60 }
 0xa22   :  { %3116 = vmatprep.subr.bf16.mxu1 %v3765_v61 }
 0xa25   :  { %3118 = vmatpush1.bf16.msra.mxu1 %v3769_v3 }
 0xa26   :  { %3120 = vmatprep.subr.bf16.mxu1 %v3773_v5 }
 0xa29   :  { %3122 = vmatpush1.bf16.msra.mxu1 %v3777_v12 }
 0xa2a   :  { %3140 = vmatprep.subr.bf16.mxu1 %v3781_v13 }
 0xadf   :  { %v1306_v57 = vpop.f32.mrb[6].mxu1 }
 0xae0   :  { %v1308_v58 = vpop.f32.mrb[7].mxu1  ;;  %v1311_v36 = vadd.f32 %v1306_v57, %v3852_v31 }
 0xae1   :  { %v1312_v62 = vadd.f32 %v1308_v58, %v3843_v52 }
 0xae2   :  { %v2771_v41 = vmul.f32 -1.442695, %v1311_v36 }
 0xae3   :  { %v2772_v63 = vmul.f32 -1.442695, %v1312_v62 }
 0xae5   :  { %3366 = vpow2.f32 %v2772_v63 }
 0xaef   :  { %v3367_v6 = vpop.eup %3366  ;;  %v1491_v32 = vpop.f32.mrb[8].mxu1 }
 0xaf0   :  { %v1320_v7 = vadd.f32 1.0, %v3367_v6  ;;  %v1493_v46 = vpop.f32.mrb[9].mxu1  ;;  %v1496_v43 = vadd.f32 %v1491_v32, %v1423_v40 }
 0xaf1   :  { %v1497_v10 = vadd.f32 %v1493_v46, %v1424_v1 }
 0xaf2   :  { %3368 = vrcp.f32 %v1320_v7  ;;  %v2777_v48 = vmul.f32 -1.442695, %v1496_v43 }
 0xaf3   :  { %v2778_v16 = vmul.f32 -1.442695, %v1497_v10 }
 0xaf5   :  { %3370 = vpow2.f32 %v2778_v16 }
 0xafc   :  { %v3369_v11 = vpop.eup %3368 }
 0xafd   :  { %v1326_v17 = vmul.f32 2.0, %v3369_v11 }
 0xaff   :  { %v3371_v18 = vpop.eup %3370  ;;  %v2774_v25 = vadd.f32 -1.0, %v1326_v17 }
 0xb00   :  { %v1505_v26 = vadd.f32 1.0, %v3371_v18 }
 0xb01   :  { %v1330_v27 = vsel %vm98_vm1, %v3369_v11, %v2774_v25 }
 0xb02   :  { %3372 = vrcp.f32 %v1505_v26  ;;  %1333 = vrot.lane.b32.xlu1 %v1330_v27, %s3581_s3 }
 0xb03   :  { %3374 = vpow2.f32 %v2771_v41 }
 0xb04   :  { %3376 = vpow2.f32 %v2777_v48 }
 0xb0c   :  { %v3373_v33 = vpop.eup %3372 }
 0xb0d   :  { %v1511_v35 = vmul.f32 2.0, %v3373_v33  ;;  %v3375_v45 = vpop.eup %3374 }
 0xb0e   :  { %v1319_v49 = vadd.f32 1.0, %v3375_v45  ;;  %v3377_v44 = vpop.eup %3376 }
 0xb0f   :  { %v2780_v59 = vadd.f32 -1.0, %v1511_v35  ;;  %v1504_v28 = vadd.f32 1.0, %v3377_v44 }
 0xb10   :  { %3378 = vrcp.f32 %v1319_v49 }
 0xb11   :  { %v1515_v2 = vsel %vm98_vm1, %v3373_v33, %v2780_v59  ;;  %3380 = vrcp.f32 %v1504_v28 }
 0xb12   :  { %1518 = vrot.lane.b32.xlu0 %v1515_v2, %s3581_s3 }
 0xb1a   :  { %v3379_v38 = vpop.eup %3378 }
 0xb1b   :  { %v3381_v53 = vpop.eup %3380  ;;  %v1331_v62 = vmul.f32 %v3379_v38, %v3957_v47 }
 0xb1c   :  { %v1516_v32 = vmul.f32 %v3381_v53, %v3962_v56 }
 0xb74   :  { %v1334_v51 = vpop.permute.xlu1 %1333 }
 0xb75   :  { %v1336_v19 = vmul.f32 %v3379_v38, %v1334_v51 }
 0xb77   :  { %1338 = vrot.lane.b32.xlu1 %v1336_v19, %s3581_s3 }
 0xb84   :  { %v1519_v58 = vpop.permute.xlu0 %1518 }
 0xb85   :  { %v1521_v57 = vmul.f32 %v3381_v53, %v1519_v58 }
 0xb87   :  { %1523 = vrot.lane.b32.xlu0 %v1521_v57, %s3581_s3  ;;  %v1719_v57 = vld [vmem:[#allocation3 + $0x50] sm:$0xff] }
 0xbe9   :  { %v1339_v63 = vpop.permute.xlu1 %1338 }
 0xbea   :  { %v4007_v1 = vadd.f32 %v1339_v63, %v1331_v62 }
 0xbec   :  { %3382 = vtanh.f32 %v4007_v1 }
 0xbf6   :  { %v3383_v6 = vpop.eup %3382 }
 0xbf7   :  { %1344 = vrot.lane.b32.xlu1 %v3383_v6, %s3581_s3 }
 0xbf9   :  { %v1524_v7 = vpop.permute.xlu0 %1523 }
 0xbfa   :  { %v4012_v46 = vadd.f32 %v1524_v7, %v1516_v32 }
 0xbfc   :  { %3384 = vtanh.f32 %v4012_v46 }
 0xc06   :  { %v3385_v10 = vpop.eup %3384 }
 0xc07   :  { %1529 = vrot.lane.b32.xlu0 %v3385_v10, %s3581_s3 }
 0xc69   :  { %v1345_v16 = vpop.permute.xlu1 %1344 }
 0xc6a   :  { %v1347_v47 = vmul.f32 %v1345_v16, %v1330_v27  ;;  %v1720_v27 = vld [vmem:[#allocation3 + $0x58] sm:$0xff] }
 0xc6c   :  { %2775 = vmatmul.mubr.msk.f32.vlgmr.msra.gmra.mrb[8].mxu0 %vm145_vm0, %v1347_v47 }
 0xc6d   :  { %3094 = vmatpush1.bf16.msra.mxu0 %v3785_v22  ;;  %1600 = vmatprep.mubr.f32.mxu0 %v3580_v0 }
 0xc6e   :  { %3096 = vmatprep.subr.bf16.mxu0 %v3789_v23 }
 0xc71   :  { %3098 = vmatpush1.bf16.msra.mxu0 %v3795_v29 }
 0xc72   :  { %3100 = vmatprep.subr.bf16.mxu0 %v3799_v30 }
 0xc75   :  { %3102 = vmatpush1.bf16.msra.mxu0 %v3802_v37 }
 0xc76   :  { %3104 = vmatprep.subr.bf16.mxu0 %v3805_v39 }
 0xc79   :  { %3106 = vmatpush1.bf16.msra.mxu0 %v3808_v42  ;;  %v1530_v56 = vpop.permute.xlu0 %1529 }
 0xc7a   :  { %v1532_v11 = vmul.f32 %v1530_v56, %v1515_v2  ;;  %3124 = vmatprep.subr.bf16.mxu0 %v3711_v4 }
 0xc7c   :  { %2781 = vmatmul.mubr.msk.f32.vlgmr.msra.gmra.mrb[8].mxu0 %vm145_vm0, %v1532_v11 }
 0xc7d   :  { %3126 = vmatpush1.bf16.msra.mxu0 %v3713_v8  ;;  %1785 = vmatprep.mubr.f32.mxu0 %v3580_v0 }
 0xc7e   :  { %3128 = vmatprep.subr.bf16.mxu0 %v3715_v9 }
 0xc81   :  { %3130 = vmatpush1.bf16.msra.mxu0 %v3719_v14 }
 0xc82   :  { %3132 = vmatprep.subr.bf16.mxu0 %v3722_v15 }
 0xc85   :  { %3134 = vmatpush1.bf16.msra.mxu0 %v3725_v20 }
 0xc86   :  { %3136 = vmatprep.subr.bf16.mxu0 %v3728_v21 }
 0xc89   :  { %3138 = vmatpush1.bf16.msra.mxu0 %v3731_v24 }
 0xc8a   :  { %3156 = vmatprep.subr.bf16.mxu0 %v3752_v50 }
 0xc8c   :  { %2787 = vmatmul.mubr.msk.f32.vlgmr.msra.gmra.mrb[10].mxu0 %vm145_vm0, %v1532_v11 }
 0xc8d   :  { %3158 = vmatpush1.bf16.msra.mxu0 %v3754_v54  ;;  %2007 = vmatprep.mubr.f32.mxu0 %v3580_v0 }
 0xc8e   :  { %3160 = vmatprep.subr.bf16.mxu0 %v3756_v55 }
 0xc91   :  { %3162 = vmatpush1.bf16.msra.mxu0 %v3761_v60 }
 0xc92   :  { %3164 = vmatprep.subr.bf16.mxu0 %v3765_v61 }
 0xc95   :  { %3166 = vmatpush1.bf16.msra.mxu0 %v3769_v3 }
 0xc96   :  { %3168 = vmatprep.subr.bf16.mxu0 %v3773_v5 }
 0xc99   :  { %3170 = vmatpush1.bf16.msra.mxu0 %v3777_v12 }
 0xc9a   :  { %3188 = vmatprep.subr.bf16.mxu0 %v3781_v13 }
 0xd4f   :  { %v1602_v17 = vpop.f32.mrb[8].mxu0 }
 0xd50   :  { %v1604_v18 = vpop.f32.mrb[9].mxu0  ;;  %v1607_v53 = vadd.f32 %v1602_v17, %v3852_v31 }
 0xd51   :  { %v1608_v25 = vadd.f32 %v1604_v18, %v3843_v52 }
 0xd52   :  { %v2782_v58 = vmul.f32 -1.442695, %v1607_v53 }
 0xd53   :  { %v2783_v26 = vmul.f32 -1.442695, %v1608_v25 }
 0xd55   :  { %3386 = vpow2.f32 %v2783_v26 }
 0xd5f   :  { %v3387_v33 = vpop.eup %3386  ;;  %v1787_v35 = vpop.f32.mrb[10].mxu0 }
 0xd60   :  { %v1616_v59 = vadd.f32 1.0, %v3387_v33  ;;  %v1789_v2 = vpop.f32.mrb[11].mxu0  ;;  %v1792_v62 = vadd.f32 %v1787_v35, %v1719_v57 }
 0xd61   :  { %v1793_v36 = vadd.f32 %v1789_v2, %v1720_v27 }
 0xd62   :  { %3388 = vrcp.f32 %v1616_v59  ;;  %v2788_v6 = vmul.f32 -1.442695, %v1792_v62 }
 0xd63   :  { %v2789_v41 = vmul.f32 -1.442695, %v1793_v36 }
 0xd65   :  { %3390 = vpow2.f32 %v2789_v41 }
 0xd6c   :  { %v3389_v40 = vpop.eup %3388 }
 0xd6d   :  { %v1622_v43 = vmul.f32 2.0, %v3389_v40 }
 0xd6f   :  { %v3391_v45 = vpop.eup %3390  ;;  %v2785_v48 = vadd.f32 -1.0, %v1622_v43 }
 0xd70   :  { %v1801_v49 = vadd.f32 1.0, %v3391_v45 }
 0xd71   :  { %v1626_v44 = vsel %vm98_vm1, %v3389_v40, %v2785_v48  ;;  %v2016_v48 = vld [vmem:[#allocation3 + $0x68] sm:$0xff] }
 0xd72   :  { %3392 = vrcp.f32 %v1801_v49  ;;  %1629 = vrot.lane.b32.xlu1 %v1626_v44, %s3581_s3 }
 0xd73   :  { %3394 = vpow2.f32 %v2782_v58 }
 0xd74   :  { %3396 = vpow2.f32 %v2788_v6  ;;  %v2015_v6 = vld [vmem:[#allocation3 + $0x60] sm:$0xff] }
 0xd7c   :  { %v3393_v38 = vpop.eup %3392 }
 0xd7d   :  { %v1807_v51 = vmul.f32 2.0, %v3393_v38  ;;  %v3395_v63 = vpop.eup %3394 }
 0xd7e   :  { %v1615_v32 = vadd.f32 1.0, %v3395_v63  ;;  %v3397_v7 = vpop.eup %3396 }
 0xd7f   :  { %v2791_v19 = vadd.f32 -1.0, %v1807_v51  ;;  %v1800_v56 = vadd.f32 1.0, %v3397_v7 }
 0xd80   :  { %3398 = vrcp.f32 %v1615_v32 }
 0xd81   :  { %v1811_v28 = vsel %vm98_vm1, %v3393_v38, %v2791_v19  ;;  %3400 = vrcp.f32 %v1800_v56 }
 0xd82   :  { %1814 = vrot.lane.b32.xlu0 %v1811_v28, %s3581_s3 }
 0xd8a   :  { %v3399_v10 = vpop.eup %3398 }
 0xd8b   :  { %v3401_v11 = vpop.eup %3400  ;;  %v1627_v25 = vmul.f32 %v3399_v10, %v4007_v1 }
 0xd8c   :  { %v1812_v35 = vmul.f32 %v3401_v11, %v4012_v46 }
 0xde4   :  { %v1630_v16 = vpop.permute.xlu1 %1629 }
 0xde5   :  { %v1632_v47 = vmul.f32 %v3399_v10, %v1630_v16 }
 0xde7   :  { %1634 = vrot.lane.b32.xlu1 %v1632_v47, %s3581_s3 }
 0xdf4   :  { %v1815_v18 = vpop.permute.xlu0 %1814 }
 0xdf5   :  { %v1817_v17 = vmul.f32 %v3401_v11, %v1815_v18 }
 0xdf7   :  { %1819 = vrot.lane.b32.xlu0 %v1817_v17, %s3581_s3 }
 0xe59   :  { %v1635_v26 = vpop.permute.xlu1 %1634 }
 0xe5a   :  { %v4057_v27 = vadd.f32 %v1635_v26, %v1627_v25 }
 0xe5c   :  { %3402 = vtanh.f32 %v4057_v27 }
 0xe66   :  { %v3403_v33 = vpop.eup %3402 }
 0xe67   :  { %1640 = vrot.lane.b32.xlu1 %v3403_v33, %s3581_s3 }
 0xe69   :  { %v1820_v59 = vpop.permute.xlu0 %1819 }
 0xe6a   :  { %v4062_v2 = vadd.f32 %v1820_v59, %v1812_v35 }
 0xe6c   :  { %3404 = vtanh.f32 %v4062_v2 }
 0xe76   :  { %v3405_v36 = vpop.eup %3404 }
 0xe77   :  { %1825 = vrot.lane.b32.xlu0 %v3405_v36, %s3581_s3 }
 0xed9   :  { %v1641_v41 = vpop.permute.xlu1 %1640 }
 0xeda   :  { %v1643_v1 = vmul.f32 %v1641_v41, %v1626_v44 }
 0xedc   :  { %2786 = vmatmul.mubr.msk.f32.vlgmr.msra.gmra.mrb[10].mxu1 %vm145_vm0, %v1643_v1 }
 0xedd   :  { %3142 = vmatpush1.bf16.msra.mxu1 %v3785_v22  ;;  %1896 = vmatprep.mubr.f32.mxu1 %v3580_v0 }
 0xede   :  { %3144 = vmatprep.subr.bf16.mxu1 %v3789_v23 }
 0xee1   :  { %3146 = vmatpush1.bf16.msra.mxu1 %v3795_v29 }
 0xee2   :  { %3148 = vmatprep.subr.bf16.mxu1 %v3799_v30 }
 0xee5   :  { %3150 = vmatpush1.bf16.msra.mxu1 %v3802_v37 }
 0xee6   :  { %3152 = vmatprep.subr.bf16.mxu1 %v3805_v39 }
 0xee9   :  { %v1826_v46 = vpop.permute.xlu0 %1825  ;;  %3154 = vmatpush1.bf16.msra.mxu1 %v3808_v42 }
 0xeea   :  { %v1828_v40 = vmul.f32 %v1826_v46, %v1811_v28  ;;  %3172 = vmatprep.subr.bf16.mxu1 %v3711_v4 }
 0xeec   :  { %2792 = vmatmul.mubr.msk.f32.vlgmr.msra.gmra.mrb[10].mxu1 %vm145_vm0, %v1828_v40 }
 0xeed   :  { %3174 = vmatpush1.bf16.msra.mxu1 %v3713_v8  ;;  %2081 = vmatprep.mubr.f32.mxu1 %v3580_v0 }
 0xeee   :  { %3176 = vmatprep.subr.bf16.mxu1 %v3715_v9 }
 0xef1   :  { %3178 = vmatpush1.bf16.msra.mxu1 %v3719_v14 }
 0xef2   :  { %3180 = vmatprep.subr.bf16.mxu1 %v3722_v15 }
 0xef5   :  { %3182 = vmatpush1.bf16.msra.mxu1 %v3725_v20 }
 0xef6   :  { %3184 = vmatprep.subr.bf16.mxu1 %v3728_v21 }
 0xef9   :  { %3186 = vmatpush1.bf16.msra.mxu1 %v3731_v24 }
 0xefa   :  { %3204 = vmatprep.subr.bf16.mxu1 %v3752_v50 }
 0xefc   :  { %2798 = vmatmul.mubr.msk.f32.vlgmr.msra.gmra.mrb[12].mxu1 %vm145_vm0, %v1828_v40 }
 0xefd   :  { %3206 = vmatpush1.bf16.msra.mxu1 %v3754_v54  ;;  %2303 = vmatprep.mubr.f32.mxu1 %v3580_v0 }
 0xefe   :  { %3208 = vmatprep.subr.bf16.mxu1 %v3756_v55 }
 0xf01   :  { %3210 = vmatpush1.bf16.msra.mxu1 %v3761_v60 }
 0xf02   :  { %3212 = vmatprep.subr.bf16.mxu1 %v3765_v61 }
 0xf05   :  { %3214 = vmatpush1.bf16.msra.mxu1 %v3769_v3 }
 0xf06   :  { %3216 = vmatprep.subr.bf16.mxu1 %v3773_v5 }
 0xf09   :  { %3218 = vmatpush1.bf16.msra.mxu1 %v3777_v12 }
 0xf0a   :  { %3236 = vmatprep.subr.bf16.mxu1 %v3781_v13 }
 0xfbf   :  { %v1898_v50 = vpop.f32.mrb[10].mxu1 }
 0xfc0   :  { %v1900_v43 = vpop.f32.mrb[11].mxu1  ;;  %v1903_v62 = vadd.f32 %v1898_v50, %v3852_v31 }
 0xfc1   :  { %v1904_v54 = vadd.f32 %v1900_v43, %v3843_v52 }
 0xfc2   :  { %v2793_v63 = vmul.f32 -1.442695, %v1903_v62 }
 0xfc3   :  { %v2794_v45 = vmul.f32 -1.442695, %v1904_v54 }
 0xfc5   :  { %3406 = vpow2.f32 %v2794_v45 }
 0xfcf   :  { %v3407_v55 = vpop.eup %3406  ;;  %v2083_v49 = vpop.f32.mrb[12].mxu1 }
 0xfd0   :  { %v1912_v60 = vadd.f32 1.0, %v3407_v55  ;;  %v2085_v44 = vpop.f32.mrb[13].mxu1  ;;  %v2088_v32 = vadd.f32 %v2083_v49, %v2015_v6  ;;  %v2312_v55 = vld [vmem:[#allocation3 + $0x78] sm:$0xff] }
 0xfd1   :  { %v2089_v61 = vadd.f32 %v2085_v44, %v2016_v48 }
 0xfd2   :  { %3408 = vrcp.f32 %v1912_v60  ;;  %v2799_v10 = vmul.f32 -1.442695, %v2088_v32 }
 0xfd3   :  { %v2800_v3 = vmul.f32 -1.442695, %v2089_v61 }
 0xfd5   :  { %3410 = vpow2.f32 %v2800_v3 }
 0xfdc   :  { %v3409_v5 = vpop.eup %3408 }
 0xfdd   :  { %v1918_v38 = vmul.f32 2.0, %v3409_v5 }
 0xfdf   :  { %v3411_v12 = vpop.eup %3410  ;;  %v2796_v51 = vadd.f32 -1.0, %v1918_v38 }
 0xfe0   :  { %v2097_v13 = vadd.f32 1.0, %v3411_v12 }
 0xfe1   :  { %v1922_v19 = vsel %vm98_vm1, %v3409_v5, %v2796_v51 }
 0xfe2   :  { %3412 = vrcp.f32 %v2097_v13  ;;  %1925 = vrot.lane.b32.xlu1 %v1922_v19, %s3581_s3 }
 0xfe3   :  { %3414 = vpow2.f32 %v2793_v63 }
 0xfe4   :  { %3416 = vpow2.f32 %v2799_v10 }
 0xfec   :  { %v3413_v28 = vpop.eup %3412 }
 0xfed   :  { %v2103_v53 = vmul.f32 2.0, %v3413_v28  ;;  %v3415_v7 = vpop.eup %3414 }
 0xfee   :  { %v1911_v16 = vadd.f32 1.0, %v3415_v7  ;;  %v3417_v47 = vpop.eup %3416 }
 0xfef   :  { %v2802_v58 = vadd.f32 -1.0, %v2103_v53  ;;  %v2096_v17 = vadd.f32 1.0, %v3417_v47  ;;  %v2311_v53 = vld [vmem:[#allocation3 + $0x70] sm:$0xff] }
 0xff0   :  { %3418 = vrcp.f32 %v1911_v16 }
 0xff1   :  { %v2107_v57 = vsel %vm98_vm1, %v3413_v28, %v2802_v58  ;;  %3420 = vrcp.f32 %v2096_v17 }
 0xff2   :  { %2110 = vrot.lane.b32.xlu0 %v2107_v57, %s3581_s3 }
 0xffa   :  { %v3419_v56 = vpop.eup %3418 }
 0xffb   :  { %v3421_v25 = vpop.eup %3420  ;;  %v1923_v35 = vmul.f32 %v3419_v56, %v4057_v27 }
 0xffc   :  { %v2108_v1 = vmul.f32 %v3421_v25, %v4062_v2 }
0x1054   :  { %v1926_v11 = vpop.permute.xlu1 %1925 }
0x1055   :  { %v1928_v18 = vmul.f32 %v3419_v56, %v1926_v11 }
0x1057   :  { %1930 = vrot.lane.b32.xlu1 %v1928_v18, %s3581_s3 }
0x1064   :  { %v2111_v26 = vpop.permute.xlu0 %2110 }
0x1065   :  { %v2113_v33 = vmul.f32 %v3421_v25, %v2111_v26 }
0x1067   :  { %2115 = vrot.lane.b32.xlu0 %v2113_v33, %s3581_s3 }
0x10c9   :  { %v1931_v59 = vpop.permute.xlu1 %1930 }
0x10ca   :  { %v4107_v36 = vadd.f32 %v1931_v59, %v1923_v35 }
0x10cc   :  { %3422 = vtanh.f32 %v4107_v36 }
0x10d6   :  { %v3423_v41 = vpop.eup %3422 }
0x10d7   :  { %1936 = vrot.lane.b32.xlu1 %v3423_v41, %s3581_s3 }
0x10d9   :  { %v2116_v46 = vpop.permute.xlu0 %2115 }
0x10da   :  { %v4112_v40 = vadd.f32 %v2116_v46, %v2108_v1 }
0x10dc   :  { %3424 = vtanh.f32 %v4112_v40 }
0x10e6   :  { %v3425_v50 = vpop.eup %3424 }
0x10e7   :  { %2121 = vrot.lane.b32.xlu0 %v3425_v50, %s3581_s3 }
0x1149   :  { %v1937_v43 = vpop.permute.xlu1 %1936 }
0x114a   :  { %v1939_v27 = vmul.f32 %v1937_v43, %v1922_v19 }
0x114c   :  { %2797 = vmatmul.mubr.msk.f32.vlgmr.msra.gmra.mrb[12].mxu0 %vm145_vm0, %v1939_v27 }
0x114d   :  { %3190 = vmatpush1.bf16.msra.mxu0 %v3785_v22  ;;  %2192 = vmatprep.mubr.f32.mxu0 %v3580_v0 }
0x114e   :  { %3192 = vmatprep.subr.bf16.mxu0 %v3789_v23 }
0x1151   :  { %3194 = vmatpush1.bf16.msra.mxu0 %v3795_v29 }
0x1152   :  { %3196 = vmatprep.subr.bf16.mxu0 %v3799_v30 }
0x1155   :  { %3198 = vmatpush1.bf16.msra.mxu0 %v3802_v37 }
0x1156   :  { %3200 = vmatprep.subr.bf16.mxu0 %v3805_v39 }
0x1159   :  { %3202 = vmatpush1.bf16.msra.mxu0 %v3808_v42  ;;  %v2122_v2 = vpop.permute.xlu0 %2121 }
0x115a   :  { %v2124_v54 = vmul.f32 %v2122_v2, %v2107_v57  ;;  %3220 = vmatprep.subr.bf16.mxu0 %v3711_v4 }
0x115c   :  { %2803 = vmatmul.mubr.msk.f32.vlgmr.msra.gmra.mrb[12].mxu0 %vm145_vm0, %v2124_v54 }
0x115d   :  { %3222 = vmatpush1.bf16.msra.mxu0 %v3713_v8  ;;  %2377 = vmatprep.mubr.f32.mxu0 %v3580_v0 }
0x115e   :  { %3224 = vmatprep.subr.bf16.mxu0 %v3715_v9 }
0x1161   :  { %3226 = vmatpush1.bf16.msra.mxu0 %v3719_v14 }
0x1162   :  { %3228 = vmatprep.subr.bf16.mxu0 %v3722_v15 }
0x1165   :  { %3230 = vmatpush1.bf16.msra.mxu0 %v3725_v20 }
0x1166   :  { %3232 = vmatprep.subr.bf16.mxu0 %v3728_v21 }
0x1169   :  { %3234 = vmatpush1.bf16.msra.mxu0 %v3731_v24 }
0x116c   :  { %2809 = vmatmul.mubr.msk.f32.vlgmr.msra.gmra.mrb[14].mxu0 %vm145_vm0, %v2124_v54 }
0x116d   :  { %2853 = vmatprep.mubr.msk.f32.mxu0 %vm3583_vm2, %v3580_v0 }
0x122f   :  { %v2194_v4 = vpop.f32.mrb[12].mxu0 }
0x1230   :  { %v2196_v45 = vpop.f32.mrb[13].mxu0  ;;  %v2199_v19 = vadd.f32 %v2194_v4, %v3852_v31 }
0x1231   :  { %v2200_v8 = vadd.f32 %v2196_v45, %v3843_v52 }
0x1232   :  { %v2804_v28 = vmul.f32 -1.442695, %v2199_v19 }
0x1233   :  { %v2805_v48 = vmul.f32 -1.442695, %v2200_v8 }
0x1235   :  { %3426 = vpow2.f32 %v2805_v48 }
0x123f   :  { %v3427_v9 = vpop.eup %3426  ;;  %v2379_v49 = vpop.f32.mrb[14].mxu0 }
0x1240   :  { %v2208_v14 = vadd.f32 1.0, %v3427_v9  ;;  %v2381_v60 = vpop.f32.mrb[15].mxu0  ;;  %v2384_v58 = vadd.f32 %v2379_v49, %v2311_v53  ;;  %v3582_v9 = vmov 0.0|0.0  }
0x1241   :  { %v2385_v15 = vadd.f32 %v2381_v60, %v2312_v55  ;;  %v2539_v55 = vld [vmem:[%s4233_s5] sm:$0xff]  ;;  %3251 = vmatprep.subr.bf16.mxu0 %v3582_v9 }
0x1242   :  { %3428 = vrcp.f32 %v2208_v14  ;;  %v2810_v62 = vmul.f32 -1.442695, %v2384_v58  ;;  %v3252_v49 = vpack.c.bf16 %v2540_v34, %v2539_v55  ;;  %v2542_v14 = vld [vmem:[%s4233_s5 + $0x18] sm:$0xff] }
0x1243   :  { %v2811_v20 = vmul.f32 -1.442695, %v2385_v15  ;;  %v2543_v15 = vld [vmem:[%s4233_s5 + $0x20] sm:$0xff]  ;;  %v2631_v58 = vld [vmem:[%s4235_s7 + $0x18] sm:$0xff] }
0x1244   :  { %3253 = vmatpush3.bf16.msra.mxu0 %v3252_v49 }
0x1245   :  { %3430 = vpow2.f32 %v2811_v20  ;;  %3254 = vmatprep.subr.bf16.mxu0 %v3582_v9  ;;  %v2544_v20 = vld [vmem:[%s4233_s5 + $0x28] sm:$0xff] }
0x124c   :  { %v3429_v21 = vpop.eup %3428 }
0x124d   :  { %v2214_v44 = vmul.f32 2.0, %v3429_v21 }
0x124f   :  { %v3431_v24 = vpop.eup %3430  ;;  %v2807_v61 = vadd.f32 -1.0, %v2214_v44  ;;  %v2545_v44 = vld [vmem:[%s4233_s5 + $0x30] sm:$0xff] }
0x1250   :  { %v2393_v3 = vadd.f32 1.0, %v3431_v24  ;;  %v2546_v24 = vld [vmem:[%s4233_s5 + $0x38] sm:$0xff] }
0x1251   :  { %v2218_v5 = vsel %vm98_vm1, %v3429_v21, %v2807_v61  ;;  %v3258_v21 = vpack.c.bf16 %v2544_v20, %v2543_v15  ;;  %v3261_v61 = vpack.c.bf16 %v2546_v24, %v2545_v44 }
0x1252   :  { %3432 = vrcp.f32 %v2393_v3  ;;  %2221 = vrot.lane.b32.xlu1 %v2218_v5, %s3581_s3 }
0x1253   :  { %3434 = vpow2.f32 %v2804_v28 }
0x1254   :  { %3436 = vpow2.f32 %v2810_v62  ;;  %v2819_v62 = vld [vmem:[%s4234_s6] ss:$0 sm:$0xff] }
0x125c   :  { %v3433_v38 = vpop.eup %3432 }
0x125d   :  { %v2399_v12 = vmul.f32 2.0, %v3433_v38  ;;  %v3435_v57 = vpop.eup %3434 }
0x125e   :  { %v2207_v63 = vadd.f32 1.0, %v3435_v57  ;;  %v3437_v6 = vpop.eup %3436 }
0x125f   :  { %v2813_v51 = vadd.f32 -1.0, %v2399_v12  ;;  %v2392_v16 = vadd.f32 1.0, %v3437_v6  ;;  %v2628_v12 = vld [vmem:[%s4235_s7] sm:$0xff] }
0x1260   :  { %3438 = vrcp.f32 %v2207_v63 }
0x1261   :  { %v2403_v13 = vsel %vm98_vm1, %v3433_v38, %v2813_v51  ;;  %3440 = vrcp.f32 %v2392_v16  ;;  %v2629_v51 = vld [vmem:[%s4235_s7 + $0x8] sm:$0xff] }
0x1262   :  { %2406 = vrot.lane.b32.xlu0 %v2403_v13, %s3581_s3 }
0x126a   :  { %v3439_v32 = vpop.eup %3438 }
0x126b   :  { %v3441_v47 = vpop.eup %3440  ;;  %v2219_v18 = vmul.f32 %v3439_v32, %v4107_v36 }
0x126c   :  { %v2404_v33 = vmul.f32 %v3441_v47, %v4112_v40 }
0x12c4   :  { %v2222_v7 = vpop.permute.xlu1 %2221 }
0x12c5   :  { %v2224_v10 = vmul.f32 %v3439_v32, %v2222_v7 }
0x12c7   :  { %2226 = vrot.lane.b32.xlu1 %v2224_v10, %s3581_s3  ;;  %v2821_v10 = vld [vmem:[%s4236_s8] ss:$0 sm:$0xff] }
0x12d4   :  { %v2407_v56 = vpop.permute.xlu0 %2406 }
0x12d5   :  { %v2409_v11 = vmul.f32 %v3441_v47, %v2407_v56 }
0x12d7   :  { %2411 = vrot.lane.b32.xlu0 %v2409_v11, %s3581_s3 }
0x1339   :  { %v2227_v17 = vpop.permute.xlu1 %2226 }
0x133a   :  { %v4147_v25 = vadd.f32 %v2227_v17, %v2219_v18 }
0x133c   :  { %3442 = vtanh.f32 %v4147_v25 }
0x1346   :  { %v3443_v26 = vpop.eup %3442 }
0x1347   :  { %2232 = vrot.lane.b32.xlu1 %v3443_v26, %s3581_s3 }
0x1349   :  { %v2412_v35 = vpop.permute.xlu0 %2411 }
0x134a   :  { %v2414_v59 = vadd.f32 %v2412_v35, %v2404_v33 }
0x134c   :  { %3444 = vtanh.f32 %v2414_v59 }
0x1356   :  { %v3445_v41 = vpop.eup %3444 }
0x1357   :  { %2417 = vrot.lane.b32.xlu0 %v3445_v41, %s3581_s3 }
0x13b9   :  { %v2233_v1 = vpop.permute.xlu1 %2232 }
0x13ba   :  { %v2235_v46 = vmul.f32 %v2233_v1, %v2218_v5 }
0x13bc   :  { %2808 = vmatmul.mubr.msk.f32.vlgmr.msra.gmra.mrb[14].mxu1 %vm145_vm0, %v2235_v46 }
0x13bd   :  { %3238 = vmatpush1.bf16.msra.mxu1 %v3785_v22  ;;  %2488 = vmatprep.mubr.f32.mxu1 %v3580_v0 }
0x13be   :  { %3240 = vmatprep.subr.bf16.mxu1 %v3789_v23 }
0x13c1   :  { %3242 = vmatpush1.bf16.msra.mxu1 %v3795_v29 }
0x13c2   :  { %3244 = vmatprep.subr.bf16.mxu1 %v3799_v30 }
0x13c5   :  { %3246 = vmatpush1.bf16.msra.mxu1 %v3802_v37 }
0x13c6   :  { %3248 = vmatprep.subr.bf16.mxu1 %v3805_v39 }
0x13c9   :  { %v2418_v36 = vpop.permute.xlu0 %2417  ;;  %3250 = vmatpush1.bf16.msra.mxu1 %v3808_v42 }
0x13ca   :  { %v2420_v40 = vmul.f32 %v2418_v36, %v2403_v13  ;;  %3263 = vmatprep.subr.bf16.mxu1 %v3582_v9  ;;  %v3264_v13 = vpack.c.bf16 %v2629_v51, %v2628_v12 }
0x13cc   :  { %2814 = vmatmul.mubr.msk.f32.vlgmr.msra.gmra.mrb[14].mxu1 %vm145_vm0, %v2420_v40 }
0x13cd   :  { %2864 = vmatprep.mubr.msk.f32.mxu1 %vm3583_vm2, %v3580_v0  ;;  %3265 = vmatpush3.bf16.msra.mxu1 %v3264_v13  ;;  %v2630_v0 = vld [vmem:[%s4235_s7 + $0x10] sm:$0xff]  ;;  %s3544_s7 = scalar_lea.vmem %s2721_s17, 128 }
0x13ce   :  { %3266 = vmatprep.subr.bf16.mxu1 %v3582_v9  ;;  %v3267_v57 = vpack.c.bf16 %v2631_v58, %v2630_v0  ;;  %p3545_p4 = scmp.ne.s32.totalorder %s2721_s17, %s3544_s7  ;;  %p3550_p6 = scmp.lt.s32.totalorder %s3544_s7, %s3544_s7 }
0x13d0   :  { %p3551_p7 = por %p3550_p6, %p3549_p5 }
0x13d1   :  { %3268 = vmatpush3.bf16.msra.mxu1 %v3267_v57 }
0x13d2   :  { %p3552_p8 = pnand %p3551_p7, %p3545_p4 }
0x149f   :  { %v2490_v50 = vpop.f32.mrb[14].mxu1 }
0x14a0   :  { %v2492_v22 = vpop.f32.mrb[15].mxu1  ;;  %v2495_v42 = vadd.f32 %v2490_v50, %v3852_v31  ;;  %v2541_v31 = vld [vmem:[%s4233_s5 + $0x10] sm:$0xff] }
0x14a1   :  { %v2496_v43 = vadd.f32 %v2492_v22, %v3843_v52  ;;  %v3255_v60 = vpack.c.bf16 %v2542_v14, %v2541_v31 }
0x14a2   :  { %v2815_v54 = vmul.f32 -1.442695, %v2495_v42 }
0x14a3   :  { %v2816_v27 = vmul.f32 -1.442695, %v2496_v43  ;;  %3256 = vmatpush3.bf16.msra.mxu0 %v3255_v60 }
0x14a4   :  { %3257 = vmatprep.subr.bf16.mxu0 %v3582_v9 }
0x14a5   :  { %3446 = vpow2.f32 %v2816_v27 }
0x14a7   :  { %3259 = vmatpush3.bf16.msra.mxu0 %v3258_v21 }
0x14a8   :  { %3260 = vmatprep.subr.bf16.mxu0 %v3582_v9 }
0x14ab   :  { %3262 = vmatpush3.bf16.msra.mxu0 %v3261_v61 }
0x14af   :  { %v3447_v23 = vpop.eup %3446 }
0x14b0   :  { %v2504_v29 = vadd.f32 1.0, %v3447_v23 }
0x14b2   :  { %3448 = vrcp.f32 %v2504_v29 }
0x14b3   :  { %3450 = vpow2.f32 %v2815_v54 }
0x14bc   :  { %v3449_v30 = vpop.eup %3448 }
0x14bd   :  { %v2510_v2 = vmul.f32 2.0, %v3449_v30  ;;  %v3451_v4 = vpop.eup %3450 }
0x14be   :  { %v2503_v45 = vadd.f32 1.0, %v3451_v4 }
0x14bf   :  { %v2818_v37 = vadd.f32 -1.0, %v2510_v2 }
0x14c0   :  { %3452 = vrcp.f32 %v2503_v45 }
0x14c1   :  { %v2514_v39 = vsel %vm98_vm1, %v3449_v30, %v2818_v37 }
0x14c2   :  { %2517 = vrot.lane.b32.xlu1 %v2514_v39, %s3581_s3 }
0x14ca   :  { %v3453_v52 = vpop.eup %3452 }
0x14cb   :  { %v2515_v3 = vmul.f32 %v3453_v52, %v4147_v25 }
0x1534   :  { %v2518_v8 = vpop.permute.xlu1 %2517 }
0x1535   :  { %v2520_v48 = vmul.f32 %v3453_v52, %v2518_v8 }
0x1537   :  { %2522 = vrot.lane.b32.xlu0 %v2520_v48, %s3581_s3 }
0x15a9   :  { %v2523_v5 = vpop.permute.xlu0 %2522 }
0x15aa   :  { %v2525_v38 = vadd.f32 %v2523_v5, %v2515_v3 }
0x15ac   :  { %3454 = vtanh.f32 %v2525_v38 }
0x15b6   :  { %v3455_v19 = vpop.eup %3454 }
0x15b7   :  { %2528 = vrot.lane.b32.xlu1 %v3455_v19, %s3581_s3 }
0x1629   :  { %v2529_v28 = vpop.permute.xlu1 %2528 }
0x162a   :  { %v2531_v53 = vmul.f32 %v2529_v28, %v2514_v39 }
0x162c   :  { %2854 = vmatmul.mubr.msk.f32.vlgmr.msra.gmra.mrb[16].mxu0 %vm145_vm0, %v2531_v53 }
0x16ff   :  { %v2623_v63 = vpop.f32.mrb[16].mxu0 }
0x1700   :  { %v2624_v6 = vadd.f32 %v2819_v62, %v2623_v63  ;;  %v2855_v32 = vpop.f32.mrb[17].mxu0 }
0x1702   :  { %v2627_v7 = vmax.f32 %v2624_v6, 0.0 }
0x1704   :  { %2865 = vmatmul.mubr.msk.f32.vlgmr.msra.gmra.mrb[16].mxu1 %vm2639_vm3, %v2627_v7 }
0x17d7   :  { %v2709_v16 = vpop.f32.mrb[16].mxu1 }
0x17d8   :  { %v2710_v47 = vadd.f32 %v2821_v10, %v2709_v16  ;;  %v2866_v56 = vpop.f32.mrb[17].mxu1 }
0x17da   :  { %2713 = vst [vmem:[#allocation11] sm:$0xff] %v2710_v47 }
0x17db   :  { %3555 = shalt.err (!%p3552_p8)
}
0x17dc   :  { %s3556_s19 = scalar_lea.hbm %s4237_s9, 128 }
0x17dd   :  { %p3557_p9 = scmp.ne.s32.totalorder %s4237_s9, %s3556_s19  ;;  %p3560_p10 = scmp.lt.u32.totalorder %s3556_s19, %s4237_s9 }
0x17df   :  { %p3562_p11 = pnand %p3560_p10, %p3557_p9 }
0x17e1   :  { %3565 = shalt.err (!%p3562_p11)
}
0x17e2   :  { %2723 = dma.vmem_to_hbm [thread:$0]  %s2721_s17, 128, %s4237_s9, [#allocation5]  }
0x17e3   :  { %3572 = dma.done.wait [#allocation5], 128  }
0x17e4   :  { %3573 = vsyncadd [#allocation5], 4294967168 }
0x17e5   :  { %2727 = vsyncpa [#allocation4], 1 }
0x17e6   :  { %2728 = vsyncpa [#allocation7], 1 }
0x17e7   :  { %2729 = vsyncpa [#allocation10], 1 }
0x17e8   :  { %2730 = vsyncpa [#allocation5], 1 }

</bundles_post_ra>
